<compile_context>
chip_gen: v7x
topology: tpu7x:2x2x1
jax: 0.10.0
libtpu: 0.0.40
codegen_flags: <defaults>
</compile_context>

<pallas_src>
import jax
import jax.numpy as jnp
from jax.experimental import pallas as pl
from jax.experimental.pallas import tpu as pltpu


def _fused_gru_kernel(x_ref, wih_ref, bgx_ref, wg_ref, wt_ref, bhn_ref,
                      wo_ref, bo_ref, out_ref, hid_ref):
    """Fully fused SequentialModel forward, everything resident in VMEM.

    x_ref:   (B, T, n_in)   raw inputs
    wih_ref: (n_in, 3H)     W_ih.T
    bgx_ref: (1, 3H)        b_ih + [b_hr, b_hz, 0]   (folded r/z hidden biases)
    wg_ref:  (H, 3H)        W.T @ W_hh.T             (fused recurrent gate weight)
    wt_ref:  (H, H)         W.T                      (h_lin = W(h_prev))
    bhn_ref: (1, H)         b_hn  (n-gate hidden bias, multiplied by r)
    wo_ref:  (H, n_out)     W_out.T
    bo_ref:  (1, n_out)     b_out
    out_ref: (B, T, n_out)  output  = hidden @ W_out.T + b_out
    hid_ref: (B, T, H)      hidden states, already in final (B, T, H) layout
    """
    B, T, _ = x_ref.shape
    H = wt_ref.shape[0]
    H2 = 2 * H
    n_out = wo_ref.shape[1]

    # Load weights once; keep them resident for the whole recurrence.
    wih = wih_ref[...]
    wg = wg_ref[...]
    wt = wt_ref[...]
    wo = wo_ref[...]
    # Hoist bias broadcasts out of the loop (broadcast_in_dim is not CSE'd).
    bgx = jnp.broadcast_to(bgx_ref[...], (B, 3 * H))
    bhn = jnp.broadcast_to(bhn_ref[...], (B, H))
    bo = jnp.broadcast_to(bo_ref[...], (B, n_out))

    h = jnp.zeros((B, H), dtype=jnp.float32)

    # T is small and static: fully unrolled -> only the h -> (gh, h_lin)
    # matmuls sit on the serial critical path.
    # TODO(synk): if T grows beyond ~32, switch to lax.fori_loop (carry = h,
    # dynamic-index stores) with unroll=4..8 to keep vreg pressure flat.
    for t in range(T):
        # Input projection for this step (independent of h -> off the chain).
        x_t = x_ref[:, t, :]                                               # (B, n_in)
        gx = jnp.dot(x_t, wih, preferred_element_type=jnp.float32) + bgx   # (B, 3H)

        if t == 0:
            # h0 == 0: skip the two dead matmuls on step 0.
            gh = jnp.zeros((B, 3 * H), dtype=jnp.float32)
            h_lin = jnp.zeros((B, H), dtype=jnp.float32)
        else:
            # Two independent matmuls off a single h (no chained W -> W_hh
            # dependency); both results land at lane offset 0, aligned with gx.
            gh = jnp.dot(h, wg, preferred_element_type=jnp.float32)        # (B, 3H)
            h_lin = jnp.dot(h, wt, preferred_element_type=jnp.float32)     # (B, H)

        # Fused r|z sigmoid over the (B, 2H) slab: one EUP round trip.
        rz = jax.nn.sigmoid(gx[:, :H2] + gh[:, :H2])
        r = rz[:, :H]
        z = rz[:, H:]
        n = jnp.tanh(gx[:, H2:] + r * (gh[:, H2:] + bhn))
        # (1-z)*n + z*h_lin  ==  n + z*(h_lin - n)   (one fewer multiply).
        h = n + z * (h_lin - n)

        # Stores go to the VMEM-resident output blocks; single HBM writeback
        # happens once at kernel end.  Output projection is off the serial
        # chain (nothing downstream depends on it inside the loop).
        hid_ref[:, t, :] = h
        out_ref[:, t, :] = jnp.dot(h, wo, preferred_element_type=jnp.float32) + bo


def sequential_model_forward(X, params):
    """X: (B, T, n_in) float32. Returns (output (B, T, n_out), hidden (B, T, H))."""
    B, T, n_in = X.shape
    H = params["W"].shape[0]
    n_out = params["W_out"].shape[0]
    f32 = jnp.float32
    hi = jax.lax.Precision.HIGHEST

    # ---- One-time weight-side precomputes (tiny, pinned to HIGHEST precision
    # so the W.T @ W_hh.T re-association does not drift vs. the unfused math).
    w_t = params["W"].T.astype(f32)                                   # (H, H)
    w_gates = jnp.dot(w_t, params["weight_hh"].T.astype(f32),
                      precision=hi)                                   # (H, 3H)
    wih_t = params["weight_ih"].T.astype(f32)                         # (n_in, 3H)
    w_out_t = params["W_out"].T.astype(f32)                           # (H, n_out)

    bih = params["bias_ih"].astype(f32)
    bhh = params["bias_hh"].astype(f32)
    # b_ih fully + b_hh's r/z parts (summed before the sigmoid); the n-gate
    # hidden bias stays separate (it is multiplied by r inside the cell).
    bias_gx = (bih + jnp.concatenate(
        [bhh[:2 * H], jnp.zeros((H,), f32)])).reshape(1, 3 * H)       # (1, 3H)
    bhh_n = bhh[2 * H:].reshape(1, H)                                 # (1, H)
    b_out = params["b_out"].astype(f32).reshape(1, n_out)             # (1, n_out)

    vmem = pl.BlockSpec(memory_space=pltpu.MemorySpace.VMEM)
    # Single invocation, no grid: all operands (a few KiB) stay VMEM-resident,
    # the recurrence runs once, and each output is written back to HBM once.
    # NOTE(perf): on v6e/v7x, casting w_gates/w_t (and gx) to bfloat16 for the
    # in-kernel matmuls would cut the per-step MXU pass count; not enabled here
    # to keep the 1e-4 match against the f32 reference.
    output, hidden = pl.pallas_call(
        _fused_gru_kernel,
        out_shape=(
            jax.ShapeDtypeStruct((B, T, n_out), f32),
            jax.ShapeDtypeStruct((B, T, H), f32),
        ),
        in_specs=[vmem] * 8,
        out_specs=(vmem, vmem),
    )(X.astype(f32), wih_t, bias_gx, w_gates, w_t, bhh_n, w_out_t, b_out)

    return output, hidden
    # TODO(synk): noise_std > 0 path (torch.normal perturbation of h) not
    # implemented; forward() uses noise_std = 0.


def _reference_forward(X, params):
    """Pure-JAX reference with the original (unfused) math, for validation."""
    B, T, _ = X.shape
    H = params["W"].shape[0]
    hi = jax.lax.Precision.HIGHEST

    def step(h, x_t):
        h_lin = jnp.dot(h, params["W"].T, precision=hi)
        gx = jnp.dot(x_t, params["weight_ih"].T, precision=hi) + params["bias_ih"]
        gh = jnp.dot(h_lin, params["weight_hh"].T, precision=hi) + params["bias_hh"]
        r = jax.nn.sigmoid(gx[:, :H] + gh[:, :H])
        z = jax.nn.sigmoid(gx[:, H:2 * H] + gh[:, H:2 * H])
        n = jnp.tanh(gx[:, 2 * H:] + r * gh[:, 2 * H:])
        h_new = (1.0 - z) * n + z * h_lin
        return h_new, h_new

    h0 = jnp.zeros((B, H), jnp.float32)
    _, hs = jax.lax.scan(step, h0, jnp.transpose(X, (1, 0, 2)))
    hidden = jnp.transpose(hs, (1, 0, 2))
    output = jnp.einsum("bth,oh->bto", hidden, params["W_out"],
                        precision=hi) + params["b_out"]
    return output, hidden


def init_params(key, n_in, n_hidden, n_out):
    ks = jax.random.split(key, 7)
    s_h = 1.0 / jnp.sqrt(n_hidden)
    return {
        # self.W : Linear(H, H, bias=False)
        "W": jax.random.uniform(ks[0], (n_hidden, n_hidden), jnp.float32, -s_h, s_h),
        # self.W_out : Linear(H, n_out, bias=True)
        "W_out": jax.random.uniform(ks[1], (n_out, n_hidden), jnp.float32, -s_h, s_h),
        "b_out": jax.random.uniform(ks[2], (n_out,), jnp.float32, -s_h, s_h),
        # GRUCell(n_in, H): weight_ih (3H, n_in), weight_hh (3H, H), biases (3H,)
        "weight_ih": jax.random.uniform(ks[3], (3 * n_hidden, n_in), jnp.float32, -s_h, s_h),
        "weight_hh": jax.random.uniform(ks[4], (3 * n_hidden, n_hidden), jnp.float32, -s_h, s_h),
        "bias_ih": jax.random.uniform(ks[5], (3 * n_hidden,), jnp.float32, -s_h, s_h),
        "bias_hh": jax.random.uniform(ks[6], (3 * n_hidden,), jnp.float32, -s_h, s_h),
    }


if __name__ == "__main__":
    B, T, n_in, n_hidden, n_out = 2, 8, 3, 32, 3
    key = jax.random.PRNGKey(0)
    k_x, k_p = jax.random.split(key)

    X = jax.random.normal(k_x, (B, T, n_in), jnp.float32)
    params = init_params(k_p, n_in, n_hidden, n_out)

    output, hidden = jax.jit(sequential_model_forward)(X, params)
    jax.block_until_ready((output, hidden))

    assert output.shape == (B, T, n_out)
    assert hidden.shape == (B, T, n_hidden)

    out_exp, hid_exp = _reference_forward(X, params)
    assert jnp.allclose(hidden, hid_exp, atol=1e-4, rtol=1e-4)
    assert jnp.allclose(output, out_exp, atol=1e-4, rtol=1e-4)

    print("KERNEL_OK")
</pallas_src>

<mosaic_0001>
module attributes {stable_mosaic.version = 11 : i64} {
  func.func @_fused_gru_kernel(%arg0: memref<2x8x3xf32, #tpu.memory_space<vmem>>, %arg1: memref<3x96xf32, #tpu.memory_space<vmem>>, %arg2: memref<1x96xf32, #tpu.memory_space<vmem>>, %arg3: memref<32x96xf32, #tpu.memory_space<vmem>>, %arg4: memref<32x32xf32, #tpu.memory_space<vmem>>, %arg5: memref<1x32xf32, #tpu.memory_space<vmem>>, %arg6: memref<32x3xf32, #tpu.memory_space<vmem>>, %arg7: memref<1x3xf32, #tpu.memory_space<vmem>>, %arg8: memref<2x8x3xf32, #tpu.memory_space<vmem>>, %arg9: memref<2x8x32xf32, #tpu.memory_space<vmem>>) attributes {dimension_semantics = [], scalar_prefetch = 0 : i64, scratch_operands = 0 : i64, tpu.core_type = #tpu.core_type<tc>} {
    %c0 = arith.constant 0 : index
    %c0_0 = arith.constant 0 : index
    %0 = vector.load %arg1[%c0, %c0_0] : memref<3x96xf32, #tpu.memory_space<vmem>>, vector<3x96xf32>
    %c0_1 = arith.constant 0 : index
    %c0_2 = arith.constant 0 : index
    %1 = vector.load %arg3[%c0_1, %c0_2] : memref<32x96xf32, #tpu.memory_space<vmem>>, vector<32x96xf32>
    %c0_3 = arith.constant 0 : index
    %c0_4 = arith.constant 0 : index
    %2 = vector.load %arg4[%c0_3, %c0_4] : memref<32x32xf32, #tpu.memory_space<vmem>>, vector<32x32xf32>
    %c0_5 = arith.constant 0 : index
    %c0_6 = arith.constant 0 : index
    %3 = vector.load %arg6[%c0_5, %c0_6] : memref<32x3xf32, #tpu.memory_space<vmem>>, vector<32x3xf32>
    %c0_7 = arith.constant 0 : index
    %c0_8 = arith.constant 0 : index
    %4 = vector.load %arg2[%c0_7, %c0_8] : memref<1x96xf32, #tpu.memory_space<vmem>>, vector<1x96xf32>
    %5 = vector.shape_cast %4 : vector<1x96xf32> to vector<1x96xf32>
    %6 = vector.broadcast %5 : vector<1x96xf32> to vector<2x96xf32>
    %c0_9 = arith.constant 0 : index
    %c0_10 = arith.constant 0 : index
    %7 = vector.load %arg5[%c0_9, %c0_10] : memref<1x32xf32, #tpu.memory_space<vmem>>, vector<1x32xf32>
    %8 = vector.shape_cast %7 : vector<1x32xf32> to vector<1x32xf32>
    %9 = vector.broadcast %8 : vector<1x32xf32> to vector<2x32xf32>
    %c0_11 = arith.constant 0 : index
    %c0_12 = arith.constant 0 : index
    %10 = vector.load %arg7[%c0_11, %c0_12] : memref<1x3xf32, #tpu.memory_space<vmem>>, vector<1x3xf32>
    %11 = vector.shape_cast %10 : vector<1x3xf32> to vector<1x3xf32>
    %12 = vector.broadcast %11 : vector<1x3xf32> to vector<2x3xf32>
    %c0_13 = arith.constant 0 : index
    %c0_14 = arith.constant 0 : index
    %c0_15 = arith.constant 0 : index
    %13 = vector.load %arg0[%c0_13, %c0_14, %c0_15] : memref<2x8x3xf32, #tpu.memory_space<vmem>>, vector<2x1x3xf32>
    %14 = vector.shape_cast %13 : vector<2x1x3xf32> to vector<2x3xf32>
    %cst = arith.constant dense<0.000000e+00> : vector<2x96xf32>
    %15 = tpu.matmul %14, %0, %cst {dimension_numbers = #tpu.dot_dimension_numbers<[1], [0], [0], [1], [0, 0, 1, 1], [], []>} : vector<2x3xf32>, vector<3x96xf32>, vector<2x96xf32> -> vector<2x96xf32>
    %16 = arith.addf %15, %6 : vector<2x96xf32>
    %cst_16 = arith.constant 0.000000e+00 : f32
    %17 = vector.broadcast %cst_16 : f32 to vector<2x96xf32>
    %cst_17 = arith.constant 0.000000e+00 : f32
    %18 = vector.broadcast %cst_17 : f32 to vector<2x32xf32>
    %19 = vector.extract_strided_slice %16 {offsets = [0, 0], sizes = [2, 64], strides = [1, 1]} : vector<2x96xf32> to vector<2x64xf32>
    %20 = vector.extract_strided_slice %17 {offsets = [0, 0], sizes = [2, 64], strides = [1, 1]} : vector<2x96xf32> to vector<2x64xf32>
    %21 = arith.addf %19, %20 : vector<2x64xf32>
    %22 = arith.negf %21 : vector<2x64xf32>
    %23 = math.exp %22 : vector<2x64xf32>
    %cst_18 = arith.constant 1.000000e+00 : f32
    %24 = vector.broadcast %cst_18 : f32 to vector<2x64xf32>
    %25 = arith.addf %24, %23 : vector<2x64xf32>
    %26 = arith.divf %24, %25 : vector<2x64xf32>
    %27 = vector.extract_strided_slice %26 {offsets = [0, 0], sizes = [2, 32], strides = [1, 1]} : vector<2x64xf32> to vector<2x32xf32>
    %28 = vector.extract_strided_slice %26 {offsets = [0, 32], sizes = [2, 32], strides = [1, 1]} : vector<2x64xf32> to vector<2x32xf32>
    %29 = vector.extract_strided_slice %16 {offsets = [0, 64], sizes = [2, 32], strides = [1, 1]} : vector<2x96xf32> to vector<2x32xf32>
    %30 = vector.extract_strided_slice %17 {offsets = [0, 64], sizes = [2, 32], strides = [1, 1]} : vector<2x96xf32> to vector<2x32xf32>
    %31 = arith.addf %30, %9 : vector<2x32xf32>
    %32 = arith.mulf %27, %31 : vector<2x32xf32>
    %33 = arith.addf %29, %32 : vector<2x32xf32>
    %34 = math.tanh %33 : vector<2x32xf32>
    %35 = arith.subf %18, %34 : vector<2x32xf32>
    %36 = arith.mulf %28, %35 : vector<2x32xf32>
    %37 = arith.addf %34, %36 : vector<2x32xf32>
    %c0_19 = arith.constant 0 : index
    %c0_20 = arith.constant 0 : index
    %c0_21 = arith.constant 0 : index
    %38 = vector.load %arg9[%c0_19, %c0_20, %c0_21] : memref<2x8x32xf32, #tpu.memory_space<vmem>>, vector<2x1x32xf32>
    %39 = vector.shape_cast %38 : vector<2x1x32xf32> to vector<2x32xf32>
    %40 = vector.shape_cast %37 : vector<2x32xf32> to vector<2x1x32xf32>
    tpu.vector_store %arg9[%c0_19, %c0_20, %c0_21], %40 {strides = array<i32>} : memref<2x8x32xf32, #tpu.memory_space<vmem>>, vector<2x1x32xf32>,
    %cst_22 = arith.constant dense<0.000000e+00> : vector<2x3xf32>
    %41 = tpu.matmul %37, %3, %cst_22 {dimension_numbers = #tpu.dot_dimension_numbers<[1], [0], [0], [1], [0, 0, 1, 1], [], []>} : vector<2x32xf32>, vector<32x3xf32>, vector<2x3xf32> -> vector<2x3xf32>
    %42 = arith.addf %41, %12 : vector<2x3xf32>
    %c0_23 = arith.constant 0 : index
    %c0_24 = arith.constant 0 : index
    %c0_25 = arith.constant 0 : index
    %43 = vector.load %arg8[%c0_23, %c0_24, %c0_25] : memref<2x8x3xf32, #tpu.memory_space<vmem>>, vector<2x1x3xf32>
    %44 = vector.shape_cast %43 : vector<2x1x3xf32> to vector<2x3xf32>
    %45 = vector.shape_cast %42 : vector<2x3xf32> to vector<2x1x3xf32>
    tpu.vector_store %arg8[%c0_23, %c0_24, %c0_25], %45 {strides = array<i32>} : memref<2x8x3xf32, #tpu.memory_space<vmem>>, vector<2x1x3xf32>,
    %c0_26 = arith.constant 0 : index
    %c1 = arith.constant 1 : index
    %c0_27 = arith.constant 0 : index
    %46 = vector.load %arg0[%c0_26, %c1, %c0_27] : memref<2x8x3xf32, #tpu.memory_space<vmem>>, vector<2x1x3xf32>
    %47 = vector.shape_cast %46 : vector<2x1x3xf32> to vector<2x3xf32>
    %cst_28 = arith.constant dense<0.000000e+00> : vector<2x96xf32>
    %48 = tpu.matmul %47, %0, %cst_28 {dimension_numbers = #tpu.dot_dimension_numbers<[1], [0], [0], [1], [0, 0, 1, 1], [], []>} : vector<2x3xf32>, vector<3x96xf32>, vector<2x96xf32> -> vector<2x96xf32>
    %49 = arith.addf %48, %6 : vector<2x96xf32>
    %cst_29 = arith.constant dense<0.000000e+00> : vector<2x96xf32>
    %50 = tpu.matmul %37, %1, %cst_29 {dimension_numbers = #tpu.dot_dimension_numbers<[1], [0], [0], [1], [0, 0, 1, 1], [], []>} : vector<2x32xf32>, vector<32x96xf32>, vector<2x96xf32> -> vector<2x96xf32>
    %cst_30 = arith.constant dense<0.000000e+00> : vector<2x32xf32>
    %51 = tpu.matmul %37, %2, %cst_30 {dimension_numbers = #tpu.dot_dimension_numbers<[1], [0], [0], [1], [0, 0, 1, 1], [], []>} : vector<2x32xf32>, vector<32x32xf32>, vector<2x32xf32> -> vector<2x32xf32>
    %52 = vector.extract_strided_slice %49 {offsets = [0, 0], sizes = [2, 64], strides = [1, 1]} : vector<2x96xf32> to vector<2x64xf32>
    %53 = vector.extract_strided_slice %50 {offsets = [0, 0], sizes = [2, 64], strides = [1, 1]} : vector<2x96xf32> to vector<2x64xf32>
    %54 = arith.addf %52, %53 : vector<2x64xf32>
    %55 = arith.negf %54 : vector<2x64xf32>
    %56 = math.exp %55 : vector<2x64xf32>
    %cst_31 = arith.constant 1.000000e+00 : f32
    %57 = vector.broadcast %cst_31 : f32 to vector<2x64xf32>
    %58 = arith.addf %57, %56 : vector<2x64xf32>
    %59 = arith.divf %57, %58 : vector<2x64xf32>
    %60 = vector.extract_strided_slice %59 {offsets = [0, 0], sizes = [2, 32], strides = [1, 1]} : vector<2x64xf32> to vector<2x32xf32>
    %61 = vector.extract_strided_slice %59 {offsets = [0, 32], sizes = [2, 32], strides = [1, 1]} : vector<2x64xf32> to vector<2x32xf32>
    %62 = vector.extract_strided_slice %49 {offsets = [0, 64], sizes = [2, 32], strides = [1, 1]} : vector<2x96xf32> to vector<2x32xf32>
    %63 = vector.extract_strided_slice %50 {offsets = [0, 64], sizes = [2, 32], strides = [1, 1]} : vector<2x96xf32> to vector<2x32xf32>
    %64 = arith.addf %63, %9 : vector<2x32xf32>
    %65 = arith.mulf %60, %64 : vector<2x32xf32>
    %66 = arith.addf %62, %65 : vector<2x32xf32>
    %67 = math.tanh %66 : vector<2x32xf32>
    %68 = arith.subf %51, %67 : vector<2x32xf32>
    %69 = arith.mulf %61, %68 : vector<2x32xf32>
    %70 = arith.addf %67, %69 : vector<2x32xf32>
    %c0_32 = arith.constant 0 : index
    %c1_33 = arith.constant 1 : index
    %c0_34 = arith.constant 0 : index
    %71 = vector.load %arg9[%c0_32, %c1_33, %c0_34] : memref<2x8x32xf32, #tpu.memory_space<vmem>>, vector<2x1x32xf32>
    %72 = vector.shape_cast %71 : vector<2x1x32xf32> to vector<2x32xf32>
    %73 = vector.shape_cast %70 : vector<2x32xf32> to vector<2x1x32xf32>
    tpu.vector_store %arg9[%c0_32, %c1_33, %c0_34], %73 {strides = array<i32>} : memref<2x8x32xf32, #tpu.memory_space<vmem>>, vector<2x1x32xf32>,
    %cst_35 = arith.constant dense<0.000000e+00> : vector<2x3xf32>
    %74 = tpu.matmul %70, %3, %cst_35 {dimension_numbers = #tpu.dot_dimension_numbers<[1], [0], [0], [1], [0, 0, 1, 1], [], []>} : vector<2x32xf32>, vector<32x3xf32>, vector<2x3xf32> -> vector<2x3xf32>
    %75 = arith.addf %74, %12 : vector<2x3xf32>
    %c0_36 = arith.constant 0 : index
    %c1_37 = arith.constant 1 : index
    %c0_38 = arith.constant 0 : index
    %76 = vector.load %arg8[%c0_36, %c1_37, %c0_38] : memref<2x8x3xf32, #tpu.memory_space<vmem>>, vector<2x1x3xf32>
    %77 = vector.shape_cast %76 : vector<2x1x3xf32> to vector<2x3xf32>
    %78 = vector.shape_cast %75 : vector<2x3xf32> to vector<2x1x3xf32>
    tpu.vector_store %arg8[%c0_36, %c1_37, %c0_38], %78 {strides = array<i32>} : memref<2x8x3xf32, #tpu.memory_space<vmem>>, vector<2x1x3xf32>,
    %c0_39 = arith.constant 0 : index
    %c2 = arith.constant 2 : index
    %c0_40 = arith.constant 0 : index
    %79 = vector.load %arg0[%c0_39, %c2, %c0_40] : memref<2x8x3xf32, #tpu.memory_space<vmem>>, vector<2x1x3xf32>
    %80 = vector.shape_cast %79 : vector<2x1x3xf32> to vector<2x3xf32>
    %cst_41 = arith.constant dense<0.000000e+00> : vector<2x96xf32>
    %81 = tpu.matmul %80, %0, %cst_41 {dimension_numbers = #tpu.dot_dimension_numbers<[1], [0], [0], [1], [0, 0, 1, 1], [], []>} : vector<2x3xf32>, vector<3x96xf32>, vector<2x96xf32> -> vector<2x96xf32>
    %82 = arith.addf %81, %6 : vector<2x96xf32>
    %cst_42 = arith.constant dense<0.000000e+00> : vector<2x96xf32>
    %83 = tpu.matmul %70, %1, %cst_42 {dimension_numbers = #tpu.dot_dimension_numbers<[1], [0], [0], [1], [0, 0, 1, 1], [], []>} : vector<2x32xf32>, vector<32x96xf32>, vector<2x96xf32> -> vector<2x96xf32>
    %cst_43 = arith.constant dense<0.000000e+00> : vector<2x32xf32>
    %84 = tpu.matmul %70, %2, %cst_43 {dimension_numbers = #tpu.dot_dimension_numbers<[1], [0], [0], [1], [0, 0, 1, 1], [], []>} : vector<2x32xf32>, vector<32x32xf32>, vector<2x32xf32> -> vector<2x32xf32>
    %85 = vector.extract_strided_slice %82 {offsets = [0, 0], sizes = [2, 64], strides = [1, 1]} : vector<2x96xf32> to vector<2x64xf32>
    %86 = vector.extract_strided_slice %83 {offsets = [0, 0], sizes = [2, 64], strides = [1, 1]} : vector<2x96xf32> to vector<2x64xf32>
    %87 = arith.addf %85, %86 : vector<2x64xf32>
    %88 = arith.negf %87 : vector<2x64xf32>
    %89 = math.exp %88 : vector<2x64xf32>
    %cst_44 = arith.constant 1.000000e+00 : f32
    %90 = vector.broadcast %cst_44 : f32 to vector<2x64xf32>
    %91 = arith.addf %90, %89 : vector<2x64xf32>
    %92 = arith.divf %90, %91 : vector<2x64xf32>
    %93 = vector.extract_strided_slice %92 {offsets = [0, 0], sizes = [2, 32], strides = [1, 1]} : vector<2x64xf32> to vector<2x32xf32>
    %94 = vector.extract_strided_slice %92 {offsets = [0, 32], sizes = [2, 32], strides = [1, 1]} : vector<2x64xf32> to vector<2x32xf32>
    %95 = vector.extract_strided_slice %82 {offsets = [0, 64], sizes = [2, 32], strides = [1, 1]} : vector<2x96xf32> to vector<2x32xf32>
    %96 = vector.extract_strided_slice %83 {offsets = [0, 64], sizes = [2, 32], strides = [1, 1]} : vector<2x96xf32> to vector<2x32xf32>
    %97 = arith.addf %96, %9 : vector<2x32xf32>
    %98 = arith.mulf %93, %97 : vector<2x32xf32>
    %99 = arith.addf %95, %98 : vector<2x32xf32>
    %100 = math.tanh %99 : vector<2x32xf32>
    %101 = arith.subf %84, %100 : vector<2x32xf32>
    %102 = arith.mulf %94, %101 : vector<2x32xf32>
    %103 = arith.addf %100, %102 : vector<2x32xf32>
    %c0_45 = arith.constant 0 : index
    %c2_46 = arith.constant 2 : index
    %c0_47 = arith.constant 0 : index
    %104 = vector.load %arg9[%c0_45, %c2_46, %c0_47] : memref<2x8x32xf32, #tpu.memory_space<vmem>>, vector<2x1x32xf32>
    %105 = vector.shape_cast %104 : vector<2x1x32xf32> to vector<2x32xf32>
    %106 = vector.shape_cast %103 : vector<2x32xf32> to vector<2x1x32xf32>
    tpu.vector_store %arg9[%c0_45, %c2_46, %c0_47], %106 {strides = array<i32>} : memref<2x8x32xf32, #tpu.memory_space<vmem>>, vector<2x1x32xf32>,
    %cst_48 = arith.constant dense<0.000000e+00> : vector<2x3xf32>
    %107 = tpu.matmul %103, %3, %cst_48 {dimension_numbers = #tpu.dot_dimension_numbers<[1], [0], [0], [1], [0, 0, 1, 1], [], []>} : vector<2x32xf32>, vector<32x3xf32>, vector<2x3xf32> -> vector<2x3xf32>
    %108 = arith.addf %107, %12 : vector<2x3xf32>
    %c0_49 = arith.constant 0 : index
    %c2_50 = arith.constant 2 : index
    %c0_51 = arith.constant 0 : index
    %109 = vector.load %arg8[%c0_49, %c2_50, %c0_51] : memref<2x8x3xf32, #tpu.memory_space<vmem>>, vector<2x1x3xf32>
    %110 = vector.shape_cast %109 : vector<2x1x3xf32> to vector<2x3xf32>
    %111 = vector.shape_cast %108 : vector<2x3xf32> to vector<2x1x3xf32>
    tpu.vector_store %arg8[%c0_49, %c2_50, %c0_51], %111 {strides = array<i32>} : memref<2x8x3xf32, #tpu.memory_space<vmem>>, vector<2x1x3xf32>,
    %c0_52 = arith.constant 0 : index
    %c3 = arith.constant 3 : index
    %c0_53 = arith.constant 0 : index
    %112 = vector.load %arg0[%c0_52, %c3, %c0_53] : memref<2x8x3xf32, #tpu.memory_space<vmem>>, vector<2x1x3xf32>
    %113 = vector.shape_cast %112 : vector<2x1x3xf32> to vector<2x3xf32>
    %cst_54 = arith.constant dense<0.000000e+00> : vector<2x96xf32>
    %114 = tpu.matmul %113, %0, %cst_54 {dimension_numbers = #tpu.dot_dimension_numbers<[1], [0], [0], [1], [0, 0, 1, 1], [], []>} : vector<2x3xf32>, vector<3x96xf32>, vector<2x96xf32> -> vector<2x96xf32>
    %115 = arith.addf %114, %6 : vector<2x96xf32>
    %cst_55 = arith.constant dense<0.000000e+00> : vector<2x96xf32>
    %116 = tpu.matmul %103, %1, %cst_55 {dimension_numbers = #tpu.dot_dimension_numbers<[1], [0], [0], [1], [0, 0, 1, 1], [], []>} : vector<2x32xf32>, vector<32x96xf32>, vector<2x96xf32> -> vector<2x96xf32>
    %cst_56 = arith.constant dense<0.000000e+00> : vector<2x32xf32>
    %117 = tpu.matmul %103, %2, %cst_56 {dimension_numbers = #tpu.dot_dimension_numbers<[1], [0], [0], [1], [0, 0, 1, 1], [], []>} : vector<2x32xf32>, vector<32x32xf32>, vector<2x32xf32> -> vector<2x32xf32>
    %118 = vector.extract_strided_slice %115 {offsets = [0, 0], sizes = [2, 64], strides = [1, 1]} : vector<2x96xf32> to vector<2x64xf32>
    %119 = vector.extract_strided_slice %116 {offsets = [0, 0], sizes = [2, 64], strides = [1, 1]} : vector<2x96xf32> to vector<2x64xf32>
    %120 = arith.addf %118, %119 : vector<2x64xf32>
    %121 = arith.negf %120 : vector<2x64xf32>
    %122 = math.exp %121 : vector<2x64xf32>
    %cst_57 = arith.constant 1.000000e+00 : f32
    %123 = vector.broadcast %cst_57 : f32 to vector<2x64xf32>
    %124 = arith.addf %123, %122 : vector<2x64xf32>
    %125 = arith.divf %123, %124 : vector<2x64xf32>
    %126 = vector.extract_strided_slice %125 {offsets = [0, 0], sizes = [2, 32], strides = [1, 1]} : vector<2x64xf32> to vector<2x32xf32>
    %127 = vector.extract_strided_slice %125 {offsets = [0, 32], sizes = [2, 32], strides = [1, 1]} : vector<2x64xf32> to vector<2x32xf32>
    %128 = vector.extract_strided_slice %115 {offsets = [0, 64], sizes = [2, 32], strides = [1, 1]} : vector<2x96xf32> to vector<2x32xf32>
    %129 = vector.extract_strided_slice %116 {offsets = [0, 64], sizes = [2, 32], strides = [1, 1]} : vector<2x96xf32> to vector<2x32xf32>
    %130 = arith.addf %129, %9 : vector<2x32xf32>
    %131 = arith.mulf %126, %130 : vector<2x32xf32>
    %132 = arith.addf %128, %131 : vector<2x32xf32>
    %133 = math.tanh %132 : vector<2x32xf32>
    %134 = arith.subf %117, %133 : vector<2x32xf32>
    %135 = arith.mulf %127, %134 : vector<2x32xf32>
    %136 = arith.addf %133, %135 : vector<2x32xf32>
    %c0_58 = arith.constant 0 : index
    %c3_59 = arith.constant 3 : index
    %c0_60 = arith.constant 0 : index
    %137 = vector.load %arg9[%c0_58, %c3_59, %c0_60] : memref<2x8x32xf32, #tpu.memory_space<vmem>>, vector<2x1x32xf32>
    %138 = vector.shape_cast %137 : vector<2x1x32xf32> to vector<2x32xf32>
    %139 = vector.shape_cast %136 : vector<2x32xf32> to vector<2x1x32xf32>
    tpu.vector_store %arg9[%c0_58, %c3_59, %c0_60], %139 {strides = array<i32>} : memref<2x8x32xf32, #tpu.memory_space<vmem>>, vector<2x1x32xf32>,
    %cst_61 = arith.constant dense<0.000000e+00> : vector<2x3xf32>
    %140 = tpu.matmul %136, %3, %cst_61 {dimension_numbers = #tpu.dot_dimension_numbers<[1], [0], [0], [1], [0, 0, 1, 1], [], []>} : vector<2x32xf32>, vector<32x3xf32>, vector<2x3xf32> -> vector<2x3xf32>
    %141 = arith.addf %140, %12 : vector<2x3xf32>
    %c0_62 = arith.constant 0 : index
    %c3_63 = arith.constant 3 : index
    %c0_64 = arith.constant 0 : index
    %142 = vector.load %arg8[%c0_62, %c3_63, %c0_64] : memref<2x8x3xf32, #tpu.memory_space<vmem>>, vector<2x1x3xf32>
    %143 = vector.shape_cast %142 : vector<2x1x3xf32> to vector<2x3xf32>
    %144 = vector.shape_cast %141 : vector<2x3xf32> to vector<2x1x3xf32>
    tpu.vector_store %arg8[%c0_62, %c3_63, %c0_64], %144 {strides = array<i32>} : memref<2x8x3xf32, #tpu.memory_space<vmem>>, vector<2x1x3xf32>,
    %c0_65 = arith.constant 0 : index
    %c4 = arith.constant 4 : index
    %c0_66 = arith.constant 0 : index
    %145 = vector.load %arg0[%c0_65, %c4, %c0_66] : memref<2x8x3xf32, #tpu.memory_space<vmem>>, vector<2x1x3xf32>
    %146 = vector.shape_cast %145 : vector<2x1x3xf32> to vector<2x3xf32>
    %cst_67 = arith.constant dense<0.000000e+00> : vector<2x96xf32>
    %147 = tpu.matmul %146, %0, %cst_67 {dimension_numbers = #tpu.dot_dimension_numbers<[1], [0], [0], [1], [0, 0, 1, 1], [], []>} : vector<2x3xf32>, vector<3x96xf32>, vector<2x96xf32> -> vector<2x96xf32>
    %148 = arith.addf %147, %6 : vector<2x96xf32>
    %cst_68 = arith.constant dense<0.000000e+00> : vector<2x96xf32>
    %149 = tpu.matmul %136, %1, %cst_68 {dimension_numbers = #tpu.dot_dimension_numbers<[1], [0], [0], [1], [0, 0, 1, 1], [], []>} : vector<2x32xf32>, vector<32x96xf32>, vector<2x96xf32> -> vector<2x96xf32>
    %cst_69 = arith.constant dense<0.000000e+00> : vector<2x32xf32>
    %150 = tpu.matmul %136, %2, %cst_69 {dimension_numbers = #tpu.dot_dimension_numbers<[1], [0], [0], [1], [0, 0, 1, 1], [], []>} : vector<2x32xf32>, vector<32x32xf32>, vector<2x32xf32> -> vector<2x32xf32>
    %151 = vector.extract_strided_slice %148 {offsets = [0, 0], sizes = [2, 64], strides = [1, 1]} : vector<2x96xf32> to vector<2x64xf32>
    %152 = vector.extract_strided_slice %149 {offsets = [0, 0], sizes = [2, 64], strides = [1, 1]} : vector<2x96xf32> to vector<2x64xf32>
    %153 = arith.addf %151, %152 : vector<2x64xf32>
    %154 = arith.negf %153 : vector<2x64xf32>
    %155 = math.exp %154 : vector<2x64xf32>
    %cst_70 = arith.constant 1.000000e+00 : f32
    %156 = vector.broadcast %cst_70 : f32 to vector<2x64xf32>
    %157 = arith.addf %156, %155 : vector<2x64xf32>
    %158 = arith.divf %156, %157 : vector<2x64xf32>
    %159 = vector.extract_strided_slice %158 {offsets = [0, 0], sizes = [2, 32], strides = [1, 1]} : vector<2x64xf32> to vector<2x32xf32>
    %160 = vector.extract_strided_slice %158 {offsets = [0, 32], sizes = [2, 32], strides = [1, 1]} : vector<2x64xf32> to vector<2x32xf32>
    %161 = vector.extract_strided_slice %148 {offsets = [0, 64], sizes = [2, 32], strides = [1, 1]} : vector<2x96xf32> to vector<2x32xf32>
    %162 = vector.extract_strided_slice %149 {offsets = [0, 64], sizes = [2, 32], strides = [1, 1]} : vector<2x96xf32> to vector<2x32xf32>
    %163 = arith.addf %162, %9 : vector<2x32xf32>
    %164 = arith.mulf %159, %163 : vector<2x32xf32>
    %165 = arith.addf %161, %164 : vector<2x32xf32>
    %166 = math.tanh %165 : vector<2x32xf32>
    %167 = arith.subf %150, %166 : vector<2x32xf32>
    %168 = arith.mulf %160, %167 : vector<2x32xf32>
    %169 = arith.addf %166, %168 : vector<2x32xf32>
    %c0_71 = arith.constant 0 : index
    %c4_72 = arith.constant 4 : index
    %c0_73 = arith.constant 0 : index
    %170 = vector.load %arg9[%c0_71, %c4_72, %c0_73] : memref<2x8x32xf32, #tpu.memory_space<vmem>>, vector<2x1x32xf32>
    %171 = vector.shape_cast %170 : vector<2x1x32xf32> to vector<2x32xf32>
    %172 = vector.shape_cast %169 : vector<2x32xf32> to vector<2x1x32xf32>
    tpu.vector_store %arg9[%c0_71, %c4_72, %c0_73], %172 {strides = array<i32>} : memref<2x8x32xf32, #tpu.memory_space<vmem>>, vector<2x1x32xf32>,
    %cst_74 = arith.constant dense<0.000000e+00> : vector<2x3xf32>
    %173 = tpu.matmul %169, %3, %cst_74 {dimension_numbers = #tpu.dot_dimension_numbers<[1], [0], [0], [1], [0, 0, 1, 1], [], []>} : vector<2x32xf32>, vector<32x3xf32>, vector<2x3xf32> -> vector<2x3xf32>
    %174 = arith.addf %173, %12 : vector<2x3xf32>
    %c0_75 = arith.constant 0 : index
    %c4_76 = arith.constant 4 : index
    %c0_77 = arith.constant 0 : index
    %175 = vector.load %arg8[%c0_75, %c4_76, %c0_77] : memref<2x8x3xf32, #tpu.memory_space<vmem>>, vector<2x1x3xf32>
    %176 = vector.shape_cast %175 : vector<2x1x3xf32> to vector<2x3xf32>
    %177 = vector.shape_cast %174 : vector<2x3xf32> to vector<2x1x3xf32>
    tpu.vector_store %arg8[%c0_75, %c4_76, %c0_77], %177 {strides = array<i32>} : memref<2x8x3xf32, #tpu.memory_space<vmem>>, vector<2x1x3xf32>,
    %c0_78 = arith.constant 0 : index
    %c5 = arith.constant 5 : index
    %c0_79 = arith.constant 0 : index
    %178 = vector.load %arg0[%c0_78, %c5, %c0_79] : memref<2x8x3xf32, #tpu.memory_space<vmem>>, vector<2x1x3xf32>
    %179 = vector.shape_cast %178 : vector<2x1x3xf32> to vector<2x3xf32>
    %cst_80 = arith.constant dense<0.000000e+00> : vector<2x96xf32>
    %180 = tpu.matmul %179, %0, %cst_80 {dimension_numbers = #tpu.dot_dimension_numbers<[1], [0], [0], [1], [0, 0, 1, 1], [], []>} : vector<2x3xf32>, vector<3x96xf32>, vector<2x96xf32> -> vector<2x96xf32>
    %181 = arith.addf %180, %6 : vector<2x96xf32>
    %cst_81 = arith.constant dense<0.000000e+00> : vector<2x96xf32>
    %182 = tpu.matmul %169, %1, %cst_81 {dimension_numbers = #tpu.dot_dimension_numbers<[1], [0], [0], [1], [0, 0, 1, 1], [], []>} : vector<2x32xf32>, vector<32x96xf32>, vector<2x96xf32> -> vector<2x96xf32>
    %cst_82 = arith.constant dense<0.000000e+00> : vector<2x32xf32>
    %183 = tpu.matmul %169, %2, %cst_82 {dimension_numbers = #tpu.dot_dimension_numbers<[1], [0], [0], [1], [0, 0, 1, 1], [], []>} : vector<2x32xf32>, vector<32x32xf32>, vector<2x32xf32> -> vector<2x32xf32>
    %184 = vector.extract_strided_slice %181 {offsets = [0, 0], sizes = [2, 64], strides = [1, 1]} : vector<2x96xf32> to vector<2x64xf32>
    %185 = vector.extract_strided_slice %182 {offsets = [0, 0], sizes = [2, 64], strides = [1, 1]} : vector<2x96xf32> to vector<2x64xf32>
    %186 = arith.addf %184, %185 : vector<2x64xf32>
    %187 = arith.negf %186 : vector<2x64xf32>
    %188 = math.exp %187 : vector<2x64xf32>
    %cst_83 = arith.constant 1.000000e+00 : f32
    %189 = vector.broadcast %cst_83 : f32 to vector<2x64xf32>
    %190 = arith.addf %189, %188 : vector<2x64xf32>
    %191 = arith.divf %189, %190 : vector<2x64xf32>
    %192 = vector.extract_strided_slice %191 {offsets = [0, 0], sizes = [2, 32], strides = [1, 1]} : vector<2x64xf32> to vector<2x32xf32>
    %193 = vector.extract_strided_slice %191 {offsets = [0, 32], sizes = [2, 32], strides = [1, 1]} : vector<2x64xf32> to vector<2x32xf32>
    %194 = vector.extract_strided_slice %181 {offsets = [0, 64], sizes = [2, 32], strides = [1, 1]} : vector<2x96xf32> to vector<2x32xf32>
    %195 = vector.extract_strided_slice %182 {offsets = [0, 64], sizes = [2, 32], strides = [1, 1]} : vector<2x96xf32> to vector<2x32xf32>
    %196 = arith.addf %195, %9 : vector<2x32xf32>
    %197 = arith.mulf %192, %196 : vector<2x32xf32>
    %198 = arith.addf %194, %197 : vector<2x32xf32>
    %199 = math.tanh %198 : vector<2x32xf32>
    %200 = arith.subf %183, %199 : vector<2x32xf32>
    %201 = arith.mulf %193, %200 : vector<2x32xf32>
    %202 = arith.addf %199, %201 : vector<2x32xf32>
    %c0_84 = arith.constant 0 : index
    %c5_85 = arith.constant 5 : index
    %c0_86 = arith.constant 0 : index
    %203 = vector.load %arg9[%c0_84, %c5_85, %c0_86] : memref<2x8x32xf32, #tpu.memory_space<vmem>>, vector<2x1x32xf32>
    %204 = vector.shape_cast %203 : vector<2x1x32xf32> to vector<2x32xf32>
    %205 = vector.shape_cast %202 : vector<2x32xf32> to vector<2x1x32xf32>
    tpu.vector_store %arg9[%c0_84, %c5_85, %c0_86], %205 {strides = array<i32>} : memref<2x8x32xf32, #tpu.memory_space<vmem>>, vector<2x1x32xf32>,
    %cst_87 = arith.constant dense<0.000000e+00> : vector<2x3xf32>
    %206 = tpu.matmul %202, %3, %cst_87 {dimension_numbers = #tpu.dot_dimension_numbers<[1], [0], [0], [1], [0, 0, 1, 1], [], []>} : vector<2x32xf32>, vector<32x3xf32>, vector<2x3xf32> -> vector<2x3xf32>
    %207 = arith.addf %206, %12 : vector<2x3xf32>
    %c0_88 = arith.constant 0 : index
    %c5_89 = arith.constant 5 : index
    %c0_90 = arith.constant 0 : index
    %208 = vector.load %arg8[%c0_88, %c5_89, %c0_90] : memref<2x8x3xf32, #tpu.memory_space<vmem>>, vector<2x1x3xf32>
    %209 = vector.shape_cast %208 : vector<2x1x3xf32> to vector<2x3xf32>
    %210 = vector.shape_cast %207 : vector<2x3xf32> to vector<2x1x3xf32>
    tpu.vector_store %arg8[%c0_88, %c5_89, %c0_90], %210 {strides = array<i32>} : memref<2x8x3xf32, #tpu.memory_space<vmem>>, vector<2x1x3xf32>,
    %c0_91 = arith.constant 0 : index
    %c6 = arith.constant 6 : index
    %c0_92 = arith.constant 0 : index
    %211 = vector.load %arg0[%c0_91, %c6, %c0_92] : memref<2x8x3xf32, #tpu.memory_space<vmem>>, vector<2x1x3xf32>
    %212 = vector.shape_cast %211 : vector<2x1x3xf32> to vector<2x3xf32>
    %cst_93 = arith.constant dense<0.000000e+00> : vector<2x96xf32>
    %213 = tpu.matmul %212, %0, %cst_93 {dimension_numbers = #tpu.dot_dimension_numbers<[1], [0], [0], [1], [0, 0, 1, 1], [], []>} : vector<2x3xf32>, vector<3x96xf32>, vector<2x96xf32> -> vector<2x96xf32>
    %214 = arith.addf %213, %6 : vector<2x96xf32>
    %cst_94 = arith.constant dense<0.000000e+00> : vector<2x96xf32>
    %215 = tpu.matmul %202, %1, %cst_94 {dimension_numbers = #tpu.dot_dimension_numbers<[1], [0], [0], [1], [0, 0, 1, 1], [], []>} : vector<2x32xf32>, vector<32x96xf32>, vector<2x96xf32> -> vector<2x96xf32>
    %cst_95 = arith.constant dense<0.000000e+00> : vector<2x32xf32>
    %216 = tpu.matmul %202, %2, %cst_95 {dimension_numbers = #tpu.dot_dimension_numbers<[1], [0], [0], [1], [0, 0, 1, 1], [], []>} : vector<2x32xf32>, vector<32x32xf32>, vector<2x32xf32> -> vector<2x32xf32>
    %217 = vector.extract_strided_slice %214 {offsets = [0, 0], sizes = [2, 64], strides = [1, 1]} : vector<2x96xf32> to vector<2x64xf32>
    %218 = vector.extract_strided_slice %215 {offsets = [0, 0], sizes = [2, 64], strides = [1, 1]} : vector<2x96xf32> to vector<2x64xf32>
    %219 = arith.addf %217, %218 : vector<2x64xf32>
    %220 = arith.negf %219 : vector<2x64xf32>
    %221 = math.exp %220 : vector<2x64xf32>
    %cst_96 = arith.constant 1.000000e+00 : f32
    %222 = vector.broadcast %cst_96 : f32 to vector<2x64xf32>
    %223 = arith.addf %222, %221 : vector<2x64xf32>
    %224 = arith.divf %222, %223 : vector<2x64xf32>
    %225 = vector.extract_strided_slice %224 {offsets = [0, 0], sizes = [2, 32], strides = [1, 1]} : vector<2x64xf32> to vector<2x32xf32>
    %226 = vector.extract_strided_slice %224 {offsets = [0, 32], sizes = [2, 32], strides = [1, 1]} : vector<2x64xf32> to vector<2x32xf32>
    %227 = vector.extract_strided_slice %214 {offsets = [0, 64], sizes = [2, 32], strides = [1, 1]} : vector<2x96xf32> to vector<2x32xf32>
    %228 = vector.extract_strided_slice %215 {offsets = [0, 64], sizes = [2, 32], strides = [1, 1]} : vector<2x96xf32> to vector<2x32xf32>
    %229 = arith.addf %228, %9 : vector<2x32xf32>
    %230 = arith.mulf %225, %229 : vector<2x32xf32>
    %231 = arith.addf %227, %230 : vector<2x32xf32>
    %232 = math.tanh %231 : vector<2x32xf32>
    %233 = arith.subf %216, %232 : vector<2x32xf32>
    %234 = arith.mulf %226, %233 : vector<2x32xf32>
    %235 = arith.addf %232, %234 : vector<2x32xf32>
    %c0_97 = arith.constant 0 : index
    %c6_98 = arith.constant 6 : index
    %c0_99 = arith.constant 0 : index
    %236 = vector.load %arg9[%c0_97, %c6_98, %c0_99] : memref<2x8x32xf32, #tpu.memory_space<vmem>>, vector<2x1x32xf32>
    %237 = vector.shape_cast %236 : vector<2x1x32xf32> to vector<2x32xf32>
    %238 = vector.shape_cast %235 : vector<2x32xf32> to vector<2x1x32xf32>
    tpu.vector_store %arg9[%c0_97, %c6_98, %c0_99], %238 {strides = array<i32>} : memref<2x8x32xf32, #tpu.memory_space<vmem>>, vector<2x1x32xf32>,
    %cst_100 = arith.constant dense<0.000000e+00> : vector<2x3xf32>
    %239 = tpu.matmul %235, %3, %cst_100 {dimension_numbers = #tpu.dot_dimension_numbers<[1], [0], [0], [1], [0, 0, 1, 1], [], []>} : vector<2x32xf32>, vector<32x3xf32>, vector<2x3xf32> -> vector<2x3xf32>
    %240 = arith.addf %239, %12 : vector<2x3xf32>
    %c0_101 = arith.constant 0 : index
    %c6_102 = arith.constant 6 : index
    %c0_103 = arith.constant 0 : index
    %241 = vector.load %arg8[%c0_101, %c6_102, %c0_103] : memref<2x8x3xf32, #tpu.memory_space<vmem>>, vector<2x1x3xf32>
    %242 = vector.shape_cast %241 : vector<2x1x3xf32> to vector<2x3xf32>
    %243 = vector.shape_cast %240 : vector<2x3xf32> to vector<2x1x3xf32>
    tpu.vector_store %arg8[%c0_101, %c6_102, %c0_103], %243 {strides = array<i32>} : memref<2x8x3xf32, #tpu.memory_space<vmem>>, vector<2x1x3xf32>,
    %c0_104 = arith.constant 0 : index
    %c7 = arith.constant 7 : index
    %c0_105 = arith.constant 0 : index
    %244 = vector.load %arg0[%c0_104, %c7, %c0_105] : memref<2x8x3xf32, #tpu.memory_space<vmem>>, vector<2x1x3xf32>
    %245 = vector.shape_cast %244 : vector<2x1x3xf32> to vector<2x3xf32>
    %cst_106 = arith.constant dense<0.000000e+00> : vector<2x96xf32>
    %246 = tpu.matmul %245, %0, %cst_106 {dimension_numbers = #tpu.dot_dimension_numbers<[1], [0], [0], [1], [0, 0, 1, 1], [], []>} : vector<2x3xf32>, vector<3x96xf32>, vector<2x96xf32> -> vector<2x96xf32>
    %247 = arith.addf %246, %6 : vector<2x96xf32>
    %cst_107 = arith.constant dense<0.000000e+00> : vector<2x96xf32>
    %248 = tpu.matmul %235, %1, %cst_107 {dimension_numbers = #tpu.dot_dimension_numbers<[1], [0], [0], [1], [0, 0, 1, 1], [], []>} : vector<2x32xf32>, vector<32x96xf32>, vector<2x96xf32> -> vector<2x96xf32>
    %cst_108 = arith.constant dense<0.000000e+00> : vector<2x32xf32>
    %249 = tpu.matmul %235, %2, %cst_108 {dimension_numbers = #tpu.dot_dimension_numbers<[1], [0], [0], [1], [0, 0, 1, 1], [], []>} : vector<2x32xf32>, vector<32x32xf32>, vector<2x32xf32> -> vector<2x32xf32>
    %250 = vector.extract_strided_slice %247 {offsets = [0, 0], sizes = [2, 64], strides = [1, 1]} : vector<2x96xf32> to vector<2x64xf32>
    %251 = vector.extract_strided_slice %248 {offsets = [0, 0], sizes = [2, 64], strides = [1, 1]} : vector<2x96xf32> to vector<2x64xf32>
    %252 = arith.addf %250, %251 : vector<2x64xf32>
    %253 = arith.negf %252 : vector<2x64xf32>
    %254 = math.exp %253 : vector<2x64xf32>
    %cst_109 = arith.constant 1.000000e+00 : f32
    %255 = vector.broadcast %cst_109 : f32 to vector<2x64xf32>
    %256 = arith.addf %255, %254 : vector<2x64xf32>
    %257 = arith.divf %255, %256 : vector<2x64xf32>
    %258 = vector.extract_strided_slice %257 {offsets = [0, 0], sizes = [2, 32], strides = [1, 1]} : vector<2x64xf32> to vector<2x32xf32>
    %259 = vector.extract_strided_slice %257 {offsets = [0, 32], sizes = [2, 32], strides = [1, 1]} : vector<2x64xf32> to vector<2x32xf32>
    %260 = vector.extract_strided_slice %247 {offsets = [0, 64], sizes = [2, 32], strides = [1, 1]} : vector<2x96xf32> to vector<2x32xf32>
    %261 = vector.extract_strided_slice %248 {offsets = [0, 64], sizes = [2, 32], strides = [1, 1]} : vector<2x96xf32> to vector<2x32xf32>
    %262 = arith.addf %261, %9 : vector<2x32xf32>
    %263 = arith.mulf %258, %262 : vector<2x32xf32>
    %264 = arith.addf %260, %263 : vector<2x32xf32>
    %265 = math.tanh %264 : vector<2x32xf32>
    %266 = arith.subf %249, %265 : vector<2x32xf32>
    %267 = arith.mulf %259, %266 : vector<2x32xf32>
    %268 = arith.addf %265, %267 : vector<2x32xf32>
    %c0_110 = arith.constant 0 : index
    %c7_111 = arith.constant 7 : index
    %c0_112 = arith.constant 0 : index
    %269 = vector.load %arg9[%c0_110, %c7_111, %c0_112] : memref<2x8x32xf32, #tpu.memory_space<vmem>>, vector<2x1x32xf32>
    %270 = vector.shape_cast %269 : vector<2x1x32xf32> to vector<2x32xf32>
    %271 = vector.shape_cast %268 : vector<2x32xf32> to vector<2x1x32xf32>
    tpu.vector_store %arg9[%c0_110, %c7_111, %c0_112], %271 {strides = array<i32>} : memref<2x8x32xf32, #tpu.memory_space<vmem>>, vector<2x1x32xf32>,
    %cst_113 = arith.constant dense<0.000000e+00> : vector<2x3xf32>
    %272 = tpu.matmul %268, %3, %cst_113 {dimension_numbers = #tpu.dot_dimension_numbers<[1], [0], [0], [1], [0, 0, 1, 1], [], []>} : vector<2x32xf32>, vector<32x3xf32>, vector<2x3xf32> -> vector<2x3xf32>
    %273 = arith.addf %272, %12 : vector<2x3xf32>
    %c0_114 = arith.constant 0 : index
    %c7_115 = arith.constant 7 : index
    %c0_116 = arith.constant 0 : index
    %274 = vector.load %arg8[%c0_114, %c7_115, %c0_116] : memref<2x8x3xf32, #tpu.memory_space<vmem>>, vector<2x1x3xf32>
    %275 = vector.shape_cast %274 : vector<2x1x3xf32> to vector<2x3xf32>
    %276 = vector.shape_cast %273 : vector<2x3xf32> to vector<2x1x3xf32>
    tpu.vector_store %arg8[%c0_114, %c7_115, %c0_116], %276 {strides = array<i32>} : memref<2x8x3xf32, #tpu.memory_space<vmem>>, vector<2x1x3xf32>,
    return
  }
}

</mosaic_0001>

<bundles_post_ra>
// kernel: sequential_model_forward.1
= control target key start
LH: loop header
LB: loop body
LE: loop exit
PB: predicated region body
PF: predicated region fallthrough
CT: control target
= control target key end

     0   :  { %vm76_vm0 = vcmask 1042432   ;;  %v3759_v1 = vmov 0.0   ;;  %vm3760_vm1 = vmmov 0   ;;  %vm71_vm2 = vcmask 1041409   ;;  %s4426_s0 = inlined_call_operand.vmem [shape: f32[2,8,3], index: 0, kind: input, shape index: {}]   ;;  %s4427_s1 = inlined_call_operand.vmem [shape: f32[3,96], index: 1, kind: input, shape index: {}]   ;;  %s4428_s2 = inlined_call_operand.vmem [shape: f32[1,96], index: 2, kind: input, shape index: {}]   ;;  %s4429_s3 = inlined_call_operand.vmem [shape: f32[32,96], index: 3, kind: input, shape index: {}]   ;;  %s4430_s4 = inlined_call_operand.vmem [shape: f32[32,32], index: 4, kind: input, shape index: {}]   ;;  %s4431_s5 = inlined_call_operand.vmem [shape: f32[1,32], index: 5, kind: input, shape index: {}]   ;;  %s4432_s6 = inlined_call_operand.vmem [shape: f32[32,3], index: 6, kind: input, shape index: {}]   ;;  %s4433_s7 = inlined_call_operand.vmem [shape: f32[1,3], index: 7, kind: input, shape index: {}]   ;;  %s4434_s8 = inlined_call_operand.vmem [shape: f32[2,8,3], index: 8, kind: output, shape index: {0}]   ;;  %s4435_s9 = inlined_call_operand.hbm [shape: f32[2,8,32], index: 9, kind: output, shape index: {1}]  }
   0x1   :  { %v3822_v0 = vld [vmem:[%s4427_s1] sm:$0x7]  ;;  %3261 = vmatprep.subr.mxu1 %v3759_v1  ;;  %3263 = vmatprep.mubr.msk.f32.mxu1 %vm3760_vm1, %v3759_v1  ;;  %v67_v3 = vld [vmem:[%s4426_s0 + $0x8] sm:$0x1]  ;;  %vm73_vm3 = vcmask 23552  }
   0x2   :  { %v66_v2 = vld [vmem:[%s4426_s0] sm:$0x1]  ;;  %3262 = vmatpush3.msk.msra.mxu1 %vm76_vm0, %v3822_v0  ;;  %v70_v4 = vrot.slane %v67_v3, 7  ;;  %3277 = vmatprep.subr.mxu0 %v3759_v1 }
   0x3   :  { %15 = vsyncpa [#allocation3], 0  ;;  %3278 = vmatpush3.msk.msra.mxu0 %vm76_vm0, %v3822_v0  ;;  %3279 = vmatprep.mubr.msk.f32.mxu0 %vm3760_vm1, %v3759_v1  ;;  %v3847_v6 = vld [vmem:[%s4428_s2] ss:$0 sm:$0xff]  ;;  %s3761_s18 = smov 64   ;;  %s3762_s19 = smov 96   ;;  %v180_v52 = vlaneseq }
   0x4   :  { %v72_v5 = vsel %vm71_vm2, %v70_v4, %v66_v2  ;;  %v3087_v13 = vld [vmem:[%s4431_s5] ss:$0 sm:$0xff]  ;;  %v42_v21 = vld [vmem:[%s4432_s6 + $0x8] sm:$0xff]  ;;  %v319_v22 = vld [vmem:[%s4426_s0 + $0x1] sm:$0x1]  ;;  %v3763_v23 = vmov 0.0|0.0  }
   0x5   :  { %3264 = vmatmul.mubr.msk.f32.vlgmr.msra.gmra.mrb[0].mxu1 %vm73_vm3, %v72_v5  ;;  %v41_v20 = vld [vmem:[%s4432_s6] sm:$0xff]  ;;  %3543 = vmatprep.subr.bf16.mxu1 %v3763_v23  ;;  %v320_v25 = vld [vmem:[%s4426_s0 + $0x9] sm:$0x1]  ;;  %v43_v30 = vld [vmem:[%s4432_s6 + $0x10] sm:$0xff]  ;;  %vm218_vm4 = vcmask 261120   ;;  %v3948_v54 = vshrl.u32 %v180_v52, 7 }
   0x6   :  { %3274 = vmatprep.mubr.msk.f32.mxu1 %vm3760_vm1, %v3759_v1  ;;  %v3865_v24 = vpack.c.bf16 %v42_v21, %v41_v20  ;;  %3549 = vmatprep.subr.bf16.mxu0 %v3763_v23  ;;  %v33_v26 = vld [vmem:[%s4429_s3] sm:$0xff]  ;;  %v34_v27 = vld [vmem:[%s4429_s3 + $0x8] sm:$0xff]  ;;  %v323_v28 = vrot.slane %v320_v25, 7  ;;  %v44_v31 = vld [vmem:[%s4432_s6 + $0x18] sm:$0xff]  ;;  %v3765_v50 = vmov 1966171168  }
   0x7   :  { %v3877_v29 = vpack.c.bf16 %v34_v27, %v33_v26  ;;  %v3886_v32 = vpack.c.bf16 %v44_v31, %v43_v30  ;;  %v35_v33 = vld [vmem:[%s4429_s3 + $0x10] sm:$0xff]  ;;  %v36_v34 = vld [vmem:[%s4429_s3 + $0x18] sm:$0xff]  ;;  %s3764_s3 = smov 32   ;;  %v37_v43 = vld [vmem:[%s4430_s4] sm:$0xff]  ;;  %v178_v51 = vunpack.c.l.s4 %v3765_v50  ;;  %vm316_vm5 = vcmask 16384  }
   0x8   :  { %3545 = vmatpush3.bf16.msra.mxu1 %v3865_v24  ;;  %v324_v35 = vsel %vm71_vm2, %v323_v28, %v319_v22  ;;  %v3898_v37 = vpack.c.bf16 %v36_v34, %v35_v33  ;;  %v38_v44 = vld [vmem:[%s4430_s4 + $0x8] sm:$0xff]  ;;  %v39_v46 = vld [vmem:[%s4430_s4 + $0x10] sm:$0xff]  ;;  %v40_v47 = vld [vmem:[%s4430_s4 + $0x18] sm:$0xff]  ;;  %vm213_vm6 = vcmask 253952  }
   0x9   :  { %3546 = vmatprep.subr.bf16.mxu1 %v3763_v23  ;;  %3280 = vmatmul.mubr.msk.f32.vlgmr.msra.gmra.mrb[0].mxu0 %vm73_vm3, %v324_v35  ;;  %v3918_v45 = vpack.c.bf16 %v38_v44, %v37_v43  ;;  %v3929_v49 = vpack.c.bf16 %v40_v47, %v39_v46  ;;  %v179_v53 = vunpack.c.0.s8 %v178_v51  ;;  %v3955_v56 = vld [vmem:[%s4433_s7] ss:$0 sm:$0xff]  ;;  %v714_v22 = vld [vmem:[%s4426_s0 + $0x2] sm:$0x1]  ;;  %v715_v25 = vld [vmem:[%s4426_s0 + $0xa] sm:$0x1] }
   0xa   :  { %3551 = vmatpush3.bf16.msra.mxu0 %v3877_v29  ;;  %3290 = vmatprep.mubr.msk.f32.mxu0 %vm3760_vm1, %v3759_v1  ;;  %v718_v26 = vrot.slane %v715_v25, 7 }
   0xb   :  { %3552 = vmatprep.subr.bf16.mxu0 %v3763_v23  ;;  %v3958_v59 = vsub.s32 %v179_v53, %v3948_v54 }
   0xc   :  { %3548 = vmatpush3.bf16.msra.mxu1 %v3886_v32  ;;  %v719_v27 = vsel %vm71_vm2, %v718_v26, %v714_v22 }
   0xd   :  { %3555 = vmatprep.subr.bf16.mxu1 %v3763_v23 }
   0xe   :  { %3554 = vmatpush3.bf16.msra.mxu0 %v3898_v37 }
   0xf   :  { %3561 = vmatprep.subr.bf16.mxu0 %v3763_v23 }
  0xd8   :  { %v146_v7 = vpop.f32.mrb[0].mxu1 }
  0xd9   :  { %v147_v8 = vadd.f32 %v3847_v6, %v146_v7  ;;  %v3265_v9 = vpop.f32.mrb[1].mxu1 }
  0xdb   :  { %v3091_v10 = vmul.f32 -1.442695, %v147_v8 }
  0xdc   :  { %v393_v41 = vpop.f32.mrb[0].mxu0 }
  0xdd   :  { %3685 = vpow2.f32 %v3091_v10  ;;  %v3281_v42 = vpop.f32.mrb[1].mxu0  ;;  %v394_v9 = vadd.f32 %v3847_v6, %v393_v41 }
  0xe7   :  { %v3686_v11 = vpop.eup %3685 }
  0xe8   :  { %v154_v12 = vadd.f32 1.0, %v3686_v11 }
  0xea   :  { %3687 = vrcp.f32 %v154_v12 }
  0xf4   :  { %v3688_v14 = vpop.eup %3687 }
  0xf5   :  { %v158_v15 = vmul.f32 %v3688_v14, %v3087_v13 }
  0xf7   :  { %160 = vrot.lane.b32.xlu0 %v158_v15, %s3761_s18 }
 0x169   :  { %v161_v16 = vpop.permute.xlu0 %160 }
 0x16a   :  { %v163_v17 = vadd.f32 %v161_v16, %v147_v8 }
 0x16c   :  { %3689 = vtanh.f32 %v163_v17 }
 0x176   :  { %v3690_v18 = vpop.eup %3689 }
 0x177   :  { %v165_v19 = vsub.f32 0.0, %v3690_v18 }
 0x179   :  { %167 = vrot.lane.b32.xlu0 %v165_v19, %s3762_s19 }
 0x17d   :  { %544 = vrot.lane.b32.xlu0 %v3087_v13, %s3761_s18 }
 0x1eb   :  { %v168_v36 = vpop.permute.xlu0 %167 }
 0x1ec   :  { %v170_v38 = vmul.f32 %v3688_v14, %v168_v36 }
 0x1ee   :  { %172 = vrot.lane.b32.xlu1 %v170_v38, %s3764_s3 }
 0x1ef   :  { %v3950_v55 = vpop.permute.xlu0 %544 }
 0x260   :  { %v173_v39 = vpop.permute.xlu1 %172 }
 0x261   :  { %v3908_v40 = vadd.f32 %v3690_v18, %v173_v39 }
 0x263   :  { %216 = vrot.lane.b32.xlu1 %v3908_v40, %s3761_s18 }
 0x2d5   :  { %v217_v48 = vpop.permute.xlu1 %216 }
 0x2d6   :  { %3275 = vmatmul.mubr.msk.f32.vlgmr.msra.gmra.mrb[2].mxu1 %vm218_vm4, %v217_v48  ;;  %3291 = vmatmul.mubr.msk.f32.vlgmr.msra.gmra.mrb[2].mxu0 %vm218_vm4, %v217_v48 }
 0x2d7   :  { %3557 = vmatpush3.bf16.msra.mxu1 %v3918_v45  ;;  %3301 = vmatprep.mubr.msk.f32.mxu1 %vm3760_vm1, %v3759_v1 }
 0x2d8   :  { %3558 = vmatprep.subr.bf16.mxu1 %v3763_v23  ;;  %3563 = vmatpush3.bf16.msra.mxu0 %v3865_v24 }
 0x2d9   :  { %3564 = vmatprep.subr.bf16.mxu0 %v3763_v23  ;;  %3312 = vmatprep.mubr.msk.f32.mxu0 %vm3760_vm1, %v3759_v1 }
 0x2db   :  { %3560 = vmatpush3.bf16.msra.mxu1 %v3929_v49 }
 0x2dc   :  { %3315 = vmatprep.subr.mxu1 %v3759_v1  ;;  %3566 = vmatpush3.bf16.msra.mxu0 %v3886_v32 }
 0x2dd   :  { %3573 = vmatprep.subr.bf16.mxu0 %v3763_v23 }
 0x2de   :  { %3302 = vmatmul.mubr.msk.f32.vlgmr.msra.gmra.mrb[4].mxu1 %vm218_vm4, %v217_v48 }
 0x2df   :  { %3316 = vmatpush3.msk.msra.mxu1 %vm76_vm0, %v3822_v0  ;;  %3317 = vmatprep.mubr.msk.f32.mxu1 %vm3760_vm1, %v3759_v1 }
 0x2e0   :  { %3567 = vmatprep.subr.bf16.mxu1 %v3763_v23 }
 0x2e2   :  { %3318 = vmatmul.mubr.msk.f32.vlgmr.msra.gmra.mrb[6].mxu1 %vm73_vm3, %v719_v27 }
 0x2e3   :  { %3569 = vmatpush3.bf16.msra.mxu1 %v3877_v29  ;;  %3328 = vmatprep.mubr.msk.f32.mxu1 %vm3760_vm1, %v3759_v1 }
 0x2e4   :  { %3570 = vmatprep.subr.bf16.mxu1 %v3763_v23 }
 0x2e7   :  { %3572 = vmatpush3.bf16.msra.mxu1 %v3898_v37 }
 0x2e8   :  { %3579 = vmatprep.subr.bf16.mxu1 %v3763_v23 }
 0x3a9   :  { %v463_v57 = vpop.f32.mrb[2].mxu0  ;;  %v287_v58 = vpop.f32.mrb[2].mxu1 }
 0x3aa   :  { %v288_v60 = vadd.f32 %v3955_v56, %v287_v58  ;;  %v3276_v61 = vpop.f32.mrb[3].mxu1  ;;  %v3292_v62 = vpop.f32.mrb[3].mxu0  ;;  %v547_v63 = vadd.f32 %v3950_v55, %v463_v57  ;;  %v537_v10 = vadd.f32 %v463_v57, %v394_v9 }
 0x3ac   :  { %v298_v2 = vrot.slane %v288_v60, %v3958_v59  ;;  %549 = vrot.lane.b32.xlu1 %v547_v63, %s3761_s18  ;;  %v3097_v11 = vmul.f32 -1.442695, %v537_v10  ;;  %v1107_v10 = vld [vmem:[%s4426_s0 + $0xb] sm:$0x1] }
 0x3ae   :  { %v299_v3 = vcombine.high %v298_v2, %v298_v2  ;;  %v306_v4 = vrot.slane %v298_v2, %v3958_v59  ;;  %3691 = vpow2.f32 %v3097_v11  ;;  %v1110_v11 = vrot.slane %v1107_v10, 7 }
 0x3b0   :  { %v313_v5 = vrot.slane %v299_v3, %v3958_v59  ;;  %317 = vst.msk [vmem:[%s4434_s8] sm:$0x1] %vm316_vm5, %v306_v4 }
 0x3b1   :  { %v533_v7 = vpop.f32.mrb[4].mxu1 }
 0x3b2   :  { %318 = vst.msk [vmem:[%s4434_s8 + $0x8] sm:$0x1] %vm316_vm5, %v313_v5  ;;  %v3303_v8 = vpop.f32.mrb[5].mxu1 }
 0x3b5   :  { %v788_v34 = vpop.f32.mrb[6].mxu1 }
 0x3b6   :  { %v3319_v35 = vpop.f32.mrb[7].mxu1  ;;  %v789_v53 = vadd.f32 %v3847_v6, %v788_v34 }
 0x3b8   :  { %v3692_v12 = vpop.eup %3691 }
 0x3b9   :  { %v541_v13 = vadd.f32 1.0, %v3692_v12 }
 0x3bb   :  { %3693 = vrcp.f32 %v541_v13 }
 0x3c5   :  { %v3694_v14 = vpop.eup %3693 }
 0x41e   :  { %v550_v15 = vpop.permute.xlu1 %549 }
 0x41f   :  { %v552_v16 = vmul.f32 %v3694_v14, %v550_v15 }
 0x421   :  { %554 = vrot.lane.b32.xlu0 %v552_v16, %s3761_s18 }
 0x493   :  { %v555_v17 = vpop.permute.xlu0 %554 }
 0x494   :  { %v557_v18 = vadd.f32 %v555_v17, %v394_v9  ;;  %v1106_v9 = vld [vmem:[%s4426_s0 + $0x3] sm:$0x1] }
 0x495   :  { %v1111_v12 = vsel %vm71_vm2, %v1110_v11, %v1106_v9 }
 0x496   :  { %3695 = vtanh.f32 %v557_v18 }
 0x4a0   :  { %v3696_v19 = vpop.eup %3695 }
 0x4a1   :  { %560 = vrot.lane.b32.xlu1 %v3696_v19, %s3761_s18 }
 0x513   :  { %v561_v20 = vpop.permute.xlu1 %560 }
 0x514   :  { %v563_v21 = vsub.f32 %v533_v7, %v561_v20 }
 0x516   :  { %565 = vrot.lane.b32.xlu0 %v563_v21, %s3764_s3 }
 0x588   :  { %v566_v28 = vpop.permute.xlu0 %565 }
 0x589   :  { %v568_v30 = vmul.f32 %v3694_v14, %v566_v28 }
 0x58b   :  { %570 = vrot.lane.b32.xlu1 %v568_v30, %s3764_s3 }
 0x5fd   :  { %v571_v31 = vpop.permute.xlu1 %570 }
 0x5fe   :  { %v3993_v33 = vadd.f32 %v3696_v19, %v571_v31 }
 0x600   :  { %613 = vrot.lane.b32.xlu0 %v3993_v33, %s3761_s18 }
 0x672   :  { %v614_v36 = vpop.permute.xlu0 %613 }
 0x673   :  { %3313 = vmatmul.mubr.msk.f32.vlgmr.msra.gmra.mrb[4].mxu0 %vm218_vm4, %v614_v36  ;;  %3329 = vmatmul.mubr.msk.f32.vlgmr.msra.gmra.mrb[8].mxu1 %vm218_vm4, %v614_v36 }
 0x674   :  { %3575 = vmatpush3.bf16.msra.mxu0 %v3918_v45  ;;  %3339 = vmatprep.mubr.msk.f32.mxu0 %vm3760_vm1, %v3759_v1 }
 0x675   :  { %3576 = vmatprep.subr.bf16.mxu0 %v3763_v23  ;;  %3581 = vmatpush3.bf16.msra.mxu1 %v3865_v24 }
 0x676   :  { %3582 = vmatprep.subr.bf16.mxu1 %v3763_v23  ;;  %3350 = vmatprep.mubr.msk.f32.mxu1 %vm3760_vm1, %v3759_v1 }
 0x678   :  { %3578 = vmatpush3.bf16.msra.mxu0 %v3929_v49 }
 0x679   :  { %3353 = vmatprep.subr.mxu0 %v3759_v1  ;;  %3584 = vmatpush3.bf16.msra.mxu1 %v3886_v32 }
 0x67a   :  { %3591 = vmatprep.subr.bf16.mxu1 %v3763_v23 }
 0x67b   :  { %3340 = vmatmul.mubr.msk.f32.vlgmr.msra.gmra.mrb[6].mxu0 %vm218_vm4, %v614_v36 }
 0x67c   :  { %3354 = vmatpush3.msk.msra.mxu0 %vm76_vm0, %v3822_v0  ;;  %3355 = vmatprep.mubr.msk.f32.mxu0 %vm3760_vm1, %v3759_v1 }
 0x67d   :  { %3585 = vmatprep.subr.bf16.mxu0 %v3763_v23 }
 0x67f   :  { %3356 = vmatmul.mubr.msk.f32.vlgmr.msra.gmra.mrb[8].mxu0 %vm73_vm3, %v1111_v12 }
 0x680   :  { %3587 = vmatpush3.bf16.msra.mxu0 %v3877_v29  ;;  %3366 = vmatprep.mubr.msk.f32.mxu0 %vm3760_vm1, %v3759_v1 }
 0x681   :  { %3588 = vmatprep.subr.bf16.mxu0 %v3763_v23 }
 0x684   :  { %3590 = vmatpush3.bf16.msra.mxu0 %v3898_v37 }
 0x685   :  { %3597 = vmatprep.subr.bf16.mxu0 %v3763_v23 }
 0x746   :  { %v683_v38 = vpop.f32.mrb[4].mxu0  ;;  %v858_v39 = vpop.f32.mrb[8].mxu1 }
 0x747   :  { %v684_v41 = vadd.f32 %v3955_v56, %v683_v38  ;;  %v939_v42 = vadd.f32 %v858_v39, %v3950_v55  ;;  %v3314_v43 = vpop.f32.mrb[5].mxu0  ;;  %v3330_v44 = vpop.f32.mrb[9].mxu1  ;;  %v932_v57 = vadd.f32 %v858_v39, %v789_v53 }
 0x749   :  { %v694_v46 = vrot.slane %v684_v41, %v3958_v59  ;;  %941 = vrot.lane.b32.xlu1 %v939_v42, %s3761_s18  ;;  %v3103_v58 = vmul.f32 -1.442695, %v932_v57  ;;  %v1498_v57 = vld [vmem:[%s4426_s0 + $0x4] sm:$0x1] }
 0x74b   :  { %v695_v47 = vcombine.high %v694_v46, %v694_v46  ;;  %v702_v48 = vrot.slane %v694_v46, %v3958_v59  ;;  %3697 = vpow2.f32 %v3103_v58  ;;  %v1499_v58 = vld [vmem:[%s4426_s0 + $0xc] sm:$0x1] }
 0x74d   :  { %v709_v50 = vrot.slane %v695_v47, %v3958_v59  ;;  %712 = vst.msk [vmem:[%s4434_s8 + $0x1] sm:$0x1] %vm316_vm5, %v702_v48 }
 0x74e   :  { %v928_v51 = vpop.f32.mrb[6].mxu0 }
 0x74f   :  { %713 = vst.msk [vmem:[%s4434_s8 + $0x9] sm:$0x1] %vm316_vm5, %v709_v50  ;;  %v3341_v52 = vpop.f32.mrb[7].mxu0 }
 0x752   :  { %v1180_v17 = vpop.f32.mrb[8].mxu0 }
 0x753   :  { %v3357_v18 = vpop.f32.mrb[9].mxu0  ;;  %v1181_v38 = vadd.f32 %v3847_v6, %v1180_v17 }
 0x755   :  { %v3698_v60 = vpop.eup %3697 }
 0x756   :  { %v936_v61 = vadd.f32 1.0, %v3698_v60  ;;  %v1502_v60 = vrot.slane %v1499_v58, 7 }
 0x758   :  { %3699 = vrcp.f32 %v936_v61  ;;  %v1503_v61 = vsel %vm71_vm2, %v1502_v60, %v1498_v57 }
 0x762   :  { %v3700_v62 = vpop.eup %3699 }
 0x7bb   :  { %v942_v63 = vpop.permute.xlu1 %941 }
 0x7bc   :  { %v944_v2 = vmul.f32 %v3700_v62, %v942_v63 }
 0x7be   :  { %946 = vrot.lane.b32.xlu0 %v944_v2, %s3761_s18 }
 0x830   :  { %v947_v3 = vpop.permute.xlu0 %946 }
 0x831   :  { %v949_v4 = vadd.f32 %v947_v3, %v789_v53 }
 0x833   :  { %3701 = vtanh.f32 %v949_v4 }
 0x83d   :  { %v3702_v5 = vpop.eup %3701 }
 0x83e   :  { %952 = vrot.lane.b32.xlu1 %v3702_v5, %s3761_s18 }
 0x8b0   :  { %v953_v7 = vpop.permute.xlu1 %952 }
 0x8b1   :  { %v955_v8 = vsub.f32 %v928_v51, %v953_v7 }
 0x8b3   :  { %957 = vrot.lane.b32.xlu0 %v955_v8, %s3764_s3 }
 0x925   :  { %v958_v13 = vpop.permute.xlu0 %957 }
 0x926   :  { %v960_v14 = vmul.f32 %v3700_v62, %v958_v13 }
 0x928   :  { %962 = vrot.lane.b32.xlu1 %v960_v14, %s3764_s3 }
 0x99a   :  { %v963_v15 = vpop.permute.xlu1 %962 }
 0x99b   :  { %v4050_v16 = vadd.f32 %v3702_v5, %v963_v15 }
 0x99d   :  { %1005 = vrot.lane.b32.xlu0 %v4050_v16, %s3761_s18 }
 0xa0f   :  { %v1006_v19 = vpop.permute.xlu0 %1005 }
 0xa10   :  { %3351 = vmatmul.mubr.msk.f32.vlgmr.msra.gmra.mrb[10].mxu1 %vm218_vm4, %v1006_v19  ;;  %3367 = vmatmul.mubr.msk.f32.vlgmr.msra.gmra.mrb[10].mxu0 %vm218_vm4, %v1006_v19 }
 0xa11   :  { %3593 = vmatpush3.bf16.msra.mxu1 %v3918_v45  ;;  %3377 = vmatprep.mubr.msk.f32.mxu1 %vm3760_vm1, %v3759_v1 }
 0xa12   :  { %3594 = vmatprep.subr.bf16.mxu1 %v3763_v23  ;;  %3599 = vmatpush3.bf16.msra.mxu0 %v3865_v24 }
 0xa13   :  { %3600 = vmatprep.subr.bf16.mxu0 %v3763_v23  ;;  %3388 = vmatprep.mubr.msk.f32.mxu0 %vm3760_vm1, %v3759_v1 }
 0xa15   :  { %3596 = vmatpush3.bf16.msra.mxu1 %v3929_v49 }
 0xa16   :  { %3391 = vmatprep.subr.mxu1 %v3759_v1  ;;  %3602 = vmatpush3.bf16.msra.mxu0 %v3886_v32 }
 0xa17   :  { %3609 = vmatprep.subr.bf16.mxu0 %v3763_v23 }
 0xa18   :  { %3378 = vmatmul.mubr.msk.f32.vlgmr.msra.gmra.mrb[12].mxu1 %vm218_vm4, %v1006_v19 }
 0xa19   :  { %3392 = vmatpush3.msk.msra.mxu1 %vm76_vm0, %v3822_v0  ;;  %3393 = vmatprep.mubr.msk.f32.mxu1 %vm3760_vm1, %v3759_v1 }
 0xa1a   :  { %3603 = vmatprep.subr.bf16.mxu1 %v3763_v23 }
 0xa1c   :  { %3394 = vmatmul.mubr.msk.f32.vlgmr.msra.gmra.mrb[14].mxu1 %vm73_vm3, %v1503_v61 }
 0xa1d   :  { %3605 = vmatpush3.bf16.msra.mxu1 %v3877_v29  ;;  %3404 = vmatprep.mubr.msk.f32.mxu1 %vm3760_vm1, %v3759_v1 }
 0xa1e   :  { %3606 = vmatprep.subr.bf16.mxu1 %v3763_v23 }
 0xa21   :  { %3608 = vmatpush3.bf16.msra.mxu1 %v3898_v37 }
 0xa22   :  { %3615 = vmatprep.subr.bf16.mxu1 %v3763_v23 }
 0xae3   :  { %v1075_v20 = vpop.f32.mrb[10].mxu1  ;;  %v1250_v21 = vpop.f32.mrb[10].mxu0 }
 0xae4   :  { %v1076_v22 = vadd.f32 %v3955_v56, %v1075_v20  ;;  %v1331_v25 = vadd.f32 %v1250_v21, %v3950_v55  ;;  %v3352_v26 = vpop.f32.mrb[11].mxu1  ;;  %v3368_v27 = vpop.f32.mrb[11].mxu0  ;;  %v1324_v39 = vadd.f32 %v1250_v21, %v1181_v38 }
 0xae6   :  { %v1086_v28 = vrot.slane %v1076_v22, %v3958_v59  ;;  %1333 = vrot.lane.b32.xlu1 %v1331_v25, %s3761_s18  ;;  %v3109_v41 = vmul.f32 -1.442695, %v1324_v39 }
 0xae8   :  { %v1087_v30 = vcombine.high %v1086_v28, %v1086_v28  ;;  %v1094_v31 = vrot.slane %v1086_v28, %v3958_v59  ;;  %3703 = vpow2.f32 %v3109_v41  ;;  %v1890_v41 = vld [vmem:[%s4426_s0 + $0x5] sm:$0x1] }
 0xaea   :  { %v1101_v34 = vrot.slane %v1087_v30, %v3958_v59  ;;  %1104 = vst.msk [vmem:[%s4434_s8 + $0x2] sm:$0x1] %vm316_vm5, %v1094_v31 }
 0xaeb   :  { %v1320_v35 = vpop.f32.mrb[12].mxu1 }
 0xaec   :  { %1105 = vst.msk [vmem:[%s4434_s8 + $0xa] sm:$0x1] %vm316_vm5, %v1101_v34  ;;  %v3379_v36 = vpop.f32.mrb[13].mxu1 }
 0xaef   :  { %v1572_v4 = vpop.f32.mrb[14].mxu1 }
 0xaf0   :  { %v3395_v5 = vpop.f32.mrb[15].mxu1  ;;  %v1573_v21 = vadd.f32 %v3847_v6, %v1572_v4 }
 0xaf2   :  { %v3704_v42 = vpop.eup %3703 }
 0xaf3   :  { %v1328_v43 = vadd.f32 1.0, %v3704_v42  ;;  %v1891_v42 = vld [vmem:[%s4426_s0 + $0xd] sm:$0x1] }
 0xaf5   :  { %3705 = vrcp.f32 %v1328_v43  ;;  %v1894_v43 = vrot.slane %v1891_v42, 7 }
 0xaff   :  { %v3706_v44 = vpop.eup %3705 }
 0xb58   :  { %v1334_v46 = vpop.permute.xlu1 %1333 }
 0xb59   :  { %v1336_v47 = vmul.f32 %v3706_v44, %v1334_v46 }
 0xb5b   :  { %1338 = vrot.lane.b32.xlu0 %v1336_v47, %s3761_s18 }
 0xbcd   :  { %v1339_v48 = vpop.permute.xlu0 %1338 }
 0xbce   :  { %v1341_v50 = vadd.f32 %v1339_v48, %v1181_v38 }
 0xbd0   :  { %3707 = vtanh.f32 %v1341_v50 }
 0xbda   :  { %v3708_v51 = vpop.eup %3707 }
 0xbdb   :  { %1344 = vrot.lane.b32.xlu1 %v3708_v51, %s3761_s18 }
 0xc4d   :  { %v1345_v52 = vpop.permute.xlu1 %1344 }
 0xc4e   :  { %v1347_v53 = vsub.f32 %v1320_v35, %v1345_v52 }
 0xc50   :  { %1349 = vrot.lane.b32.xlu0 %v1347_v53, %s3764_s3 }
 0xcc2   :  { %v1350_v62 = vpop.permute.xlu0 %1349 }
 0xcc3   :  { %v1352_v63 = vmul.f32 %v3706_v44, %v1350_v62  ;;  %v1895_v44 = vsel %vm71_vm2, %v1894_v43, %v1890_v41 }
 0xcc5   :  { %1354 = vrot.lane.b32.xlu1 %v1352_v63, %s3764_s3 }
 0xd37   :  { %v1355_v2 = vpop.permute.xlu1 %1354 }
 0xd38   :  { %v4107_v3 = vadd.f32 %v3708_v51, %v1355_v2 }
 0xd3a   :  { %1397 = vrot.lane.b32.xlu0 %v4107_v3, %s3761_s18 }
 0xdac   :  { %v1398_v7 = vpop.permute.xlu0 %1397 }
 0xdad   :  { %3389 = vmatmul.mubr.msk.f32.vlgmr.msra.gmra.mrb[12].mxu0 %vm218_vm4, %v1398_v7  ;;  %3405 = vmatmul.mubr.msk.f32.vlgmr.msra.gmra.mrb[16].mxu1 %vm218_vm4, %v1398_v7 }
 0xdae   :  { %3611 = vmatpush3.bf16.msra.mxu0 %v3918_v45  ;;  %3415 = vmatprep.mubr.msk.f32.mxu0 %vm3760_vm1, %v3759_v1 }
 0xdaf   :  { %3612 = vmatprep.subr.bf16.mxu0 %v3763_v23  ;;  %3617 = vmatpush3.bf16.msra.mxu1 %v3865_v24 }
 0xdb0   :  { %3618 = vmatprep.subr.bf16.mxu1 %v3763_v23  ;;  %3426 = vmatprep.mubr.msk.f32.mxu1 %vm3760_vm1, %v3759_v1 }
 0xdb2   :  { %3614 = vmatpush3.bf16.msra.mxu0 %v3929_v49 }
 0xdb3   :  { %3429 = vmatprep.subr.mxu0 %v3759_v1  ;;  %3620 = vmatpush3.bf16.msra.mxu1 %v3886_v32 }
 0xdb4   :  { %3627 = vmatprep.subr.bf16.mxu1 %v3763_v23 }
 0xdb5   :  { %3416 = vmatmul.mubr.msk.f32.vlgmr.msra.gmra.mrb[14].mxu0 %vm218_vm4, %v1398_v7 }
 0xdb6   :  { %3430 = vmatpush3.msk.msra.mxu0 %vm76_vm0, %v3822_v0  ;;  %3431 = vmatprep.mubr.msk.f32.mxu0 %vm3760_vm1, %v3759_v1 }
 0xdb7   :  { %3621 = vmatprep.subr.bf16.mxu0 %v3763_v23 }
 0xdb9   :  { %3432 = vmatmul.mubr.msk.f32.vlgmr.msra.gmra.mrb[16].mxu0 %vm73_vm3, %v1895_v44 }
 0xdba   :  { %3623 = vmatpush3.bf16.msra.mxu0 %v3877_v29  ;;  %3442 = vmatprep.mubr.msk.f32.mxu0 %vm3760_vm1, %v3759_v1 }
 0xdbb   :  { %3624 = vmatprep.subr.bf16.mxu0 %v3763_v23 }
 0xdbe   :  { %3626 = vmatpush3.bf16.msra.mxu0 %v3898_v37 }
 0xdbf   :  { %3633 = vmatprep.subr.bf16.mxu0 %v3763_v23 }
 0xe80   :  { %v1467_v8 = vpop.f32.mrb[12].mxu0  ;;  %v1642_v9 = vpop.f32.mrb[16].mxu1 }
 0xe81   :  { %v1468_v10 = vadd.f32 %v3955_v56, %v1467_v8  ;;  %v1723_v11 = vadd.f32 %v1642_v9, %v3950_v55  ;;  %v3390_v12 = vpop.f32.mrb[13].mxu0  ;;  %v3406_v13 = vpop.f32.mrb[17].mxu1  ;;  %v1716_v22 = vadd.f32 %v1642_v9, %v1573_v21 }
 0xe83   :  { %v1478_v14 = vrot.slane %v1468_v10, %v3958_v59  ;;  %1725 = vrot.lane.b32.xlu1 %v1723_v11, %s3761_s18  ;;  %v3115_v25 = vmul.f32 -1.442695, %v1716_v22 }
 0xe85   :  { %v1479_v15 = vcombine.high %v1478_v14, %v1478_v14  ;;  %v1486_v17 = vrot.slane %v1478_v14, %v3958_v59  ;;  %3709 = vpow2.f32 %v3115_v25 }
 0xe87   :  { %v1493_v18 = vrot.slane %v1479_v15, %v3958_v59  ;;  %1496 = vst.msk [vmem:[%s4434_s8 + $0x3] sm:$0x1] %vm316_vm5, %v1486_v17 }
 0xe88   :  { %v1712_v19 = vpop.f32.mrb[14].mxu0 }
 0xe89   :  { %1497 = vst.msk [vmem:[%s4434_s8 + $0xb] sm:$0x1] %vm316_vm5, %v1493_v18  ;;  %v3417_v20 = vpop.f32.mrb[15].mxu0 }
 0xe8c   :  { %v1964_v51 = vpop.f32.mrb[16].mxu0 }
 0xe8d   :  { %v3433_v52 = vpop.f32.mrb[17].mxu0  ;;  %v1965_v10 = vadd.f32 %v3847_v6, %v1964_v51 }
 0xe8f   :  { %v3710_v26 = vpop.eup %3709 }
 0xe90   :  { %v1720_v27 = vadd.f32 1.0, %v3710_v26  ;;  %v2282_v26 = vld [vmem:[%s4426_s0 + $0x6] sm:$0x1] }
 0xe92   :  { %3711 = vrcp.f32 %v1720_v27  ;;  %v2283_v27 = vld [vmem:[%s4426_s0 + $0xe] sm:$0x1] }
 0xe9c   :  { %v3712_v28 = vpop.eup %3711 }
 0xef5   :  { %v1726_v30 = vpop.permute.xlu1 %1725 }
 0xef6   :  { %v1728_v31 = vmul.f32 %v3712_v28, %v1726_v30 }
 0xef8   :  { %1730 = vrot.lane.b32.xlu0 %v1728_v31, %s3761_s18 }
 0xf6a   :  { %v1731_v34 = vpop.permute.xlu0 %1730 }
 0xf6b   :  { %v1733_v35 = vadd.f32 %v1731_v34, %v1573_v21 }
 0xf6d   :  { %3713 = vtanh.f32 %v1733_v35 }
 0xf77   :  { %v3714_v36 = vpop.eup %3713 }
 0xf78   :  { %1736 = vrot.lane.b32.xlu1 %v3714_v36, %s3761_s18 }
 0xfea   :  { %v1737_v38 = vpop.permute.xlu1 %1736 }
 0xfeb   :  { %v1739_v39 = vsub.f32 %v1712_v19, %v1737_v38 }
 0xfed   :  { %1741 = vrot.lane.b32.xlu0 %v1739_v39, %s3764_s3 }
0x105f   :  { %v1742_v46 = vpop.permute.xlu0 %1741 }
0x1060   :  { %v1744_v47 = vmul.f32 %v3712_v28, %v1742_v46  ;;  %v2286_v28 = vrot.slane %v2283_v27, 7 }
0x1062   :  { %1746 = vrot.lane.b32.xlu1 %v1744_v47, %s3764_s3  ;;  %v2287_v30 = vsel %vm71_vm2, %v2286_v28, %v2282_v26 }
0x10d4   :  { %v1747_v48 = vpop.permute.xlu1 %1746 }
0x10d5   :  { %v4164_v50 = vadd.f32 %v3714_v36, %v1747_v48 }
0x10d7   :  { %1789 = vrot.lane.b32.xlu0 %v4164_v50, %s3761_s18 }
0x1149   :  { %v1790_v53 = vpop.permute.xlu0 %1789 }
0x114a   :  { %3427 = vmatmul.mubr.msk.f32.vlgmr.msra.gmra.mrb[18].mxu1 %vm218_vm4, %v1790_v53  ;;  %3443 = vmatmul.mubr.msk.f32.vlgmr.msra.gmra.mrb[18].mxu0 %vm218_vm4, %v1790_v53 }
0x114b   :  { %3629 = vmatpush3.bf16.msra.mxu1 %v3918_v45  ;;  %3453 = vmatprep.mubr.msk.f32.mxu1 %vm3760_vm1, %v3759_v1 }
0x114c   :  { %3630 = vmatprep.subr.bf16.mxu1 %v3763_v23  ;;  %3635 = vmatpush3.bf16.msra.mxu0 %v3865_v24 }
0x114d   :  { %3636 = vmatprep.subr.bf16.mxu0 %v3763_v23  ;;  %3464 = vmatprep.mubr.msk.f32.mxu0 %vm3760_vm1, %v3759_v1 }
0x114f   :  { %3632 = vmatpush3.bf16.msra.mxu1 %v3929_v49 }
0x1150   :  { %3467 = vmatprep.subr.mxu1 %v3759_v1  ;;  %3638 = vmatpush3.bf16.msra.mxu0 %v3886_v32 }
0x1151   :  { %3645 = vmatprep.subr.bf16.mxu0 %v3763_v23 }
0x1152   :  { %3454 = vmatmul.mubr.msk.f32.vlgmr.msra.gmra.mrb[20].mxu1 %vm218_vm4, %v1790_v53 }
0x1153   :  { %3468 = vmatpush3.msk.msra.mxu1 %vm76_vm0, %v3822_v0  ;;  %3469 = vmatprep.mubr.msk.f32.mxu1 %vm3760_vm1, %v3759_v1 }
0x1154   :  { %3639 = vmatprep.subr.bf16.mxu1 %v3763_v23 }
0x1156   :  { %3470 = vmatmul.mubr.msk.f32.vlgmr.msra.gmra.mrb[22].mxu1 %vm73_vm3, %v2287_v30 }
0x1157   :  { %3641 = vmatpush3.bf16.msra.mxu1 %v3877_v29  ;;  %3480 = vmatprep.mubr.msk.f32.mxu1 %vm3760_vm1, %v3759_v1 }
0x1158   :  { %3642 = vmatprep.subr.bf16.mxu1 %v3763_v23 }
0x115b   :  { %3644 = vmatpush3.bf16.msra.mxu1 %v3898_v37 }
0x115c   :  { %3651 = vmatprep.subr.bf16.mxu1 %v3763_v23 }
0x121d   :  { %v1859_v57 = vpop.f32.mrb[18].mxu1  ;;  %v2034_v58 = vpop.f32.mrb[18].mxu0 }
0x121e   :  { %v1860_v60 = vadd.f32 %v3955_v56, %v1859_v57  ;;  %v2115_v61 = vadd.f32 %v2034_v58, %v3950_v55  ;;  %v3428_v62 = vpop.f32.mrb[19].mxu1  ;;  %v3444_v63 = vpop.f32.mrb[19].mxu0  ;;  %v2108_v11 = vadd.f32 %v2034_v58, %v1965_v10 }
0x1220   :  { %v1870_v2 = vrot.slane %v1860_v60, %v3958_v59  ;;  %2117 = vrot.lane.b32.xlu1 %v2115_v61, %s3761_s18  ;;  %v3121_v12 = vmul.f32 -1.442695, %v2108_v11 }
0x1222   :  { %v1871_v4 = vcombine.high %v1870_v2, %v1870_v2  ;;  %v1878_v5 = vrot.slane %v1870_v2, %v3958_v59  ;;  %3715 = vpow2.f32 %v3121_v12 }
0x1224   :  { %v1885_v7 = vrot.slane %v1871_v4, %v3958_v59  ;;  %1888 = vst.msk [vmem:[%s4434_s8 + $0x4] sm:$0x1] %vm316_vm5, %v1878_v5 }
0x1225   :  { %v2104_v8 = vpop.f32.mrb[20].mxu1 }
0x1226   :  { %1889 = vst.msk [vmem:[%s4434_s8 + $0xc] sm:$0x1] %vm316_vm5, %v1885_v7  ;;  %v3455_v9 = vpop.f32.mrb[21].mxu1 }
0x1229   :  { %v2356_v38 = vpop.f32.mrb[22].mxu1 }
0x122a   :  { %v3471_v39 = vpop.f32.mrb[23].mxu1  ;;  %v2357_v60 = vadd.f32 %v3847_v6, %v2356_v38  ;;  %v2674_v6 = vld [vmem:[%s4426_s0 + $0x7] sm:$0x1] }
0x122c   :  { %v3716_v13 = vpop.eup %3715 }
0x122d   :  { %v2112_v14 = vadd.f32 1.0, %v3716_v13  ;;  %v2675_v13 = vld [vmem:[%s4426_s0 + $0xf] sm:$0x1] }
0x122f   :  { %3717 = vrcp.f32 %v2112_v14  ;;  %v2678_v14 = vrot.slane %v2675_v13, 7 }
0x1239   :  { %v3718_v15 = vpop.eup %3717 }
0x1292   :  { %v2118_v17 = vpop.permute.xlu1 %2117 }
0x1293   :  { %v2120_v18 = vmul.f32 %v3718_v15, %v2118_v17 }
0x1295   :  { %2122 = vrot.lane.b32.xlu0 %v2120_v18, %s3761_s18 }
0x1307   :  { %v2123_v19 = vpop.permute.xlu0 %2122 }
0x1308   :  { %v2125_v20 = vadd.f32 %v2123_v19, %v1965_v10 }
0x130a   :  { %3719 = vtanh.f32 %v2125_v20 }
0x1314   :  { %v3720_v21 = vpop.eup %3719 }
0x1315   :  { %2128 = vrot.lane.b32.xlu1 %v3720_v21, %s3761_s18 }
0x1387   :  { %v2129_v22 = vpop.permute.xlu1 %2128 }
0x1388   :  { %v2131_v25 = vsub.f32 %v2104_v8, %v2129_v22 }
0x138a   :  { %2133 = vrot.lane.b32.xlu0 %v2131_v25, %s3764_s3 }
0x13fc   :  { %v2134_v31 = vpop.permute.xlu0 %2133 }
0x13fd   :  { %v2136_v34 = vmul.f32 %v3718_v15, %v2134_v31  ;;  %v2679_v15 = vsel %vm71_vm2, %v2678_v14, %v2674_v6 }
0x13ff   :  { %2138 = vrot.lane.b32.xlu1 %v2136_v34, %s3764_s3 }
0x1471   :  { %v2139_v35 = vpop.permute.xlu1 %2138 }
0x1472   :  { %v4221_v36 = vadd.f32 %v3720_v21, %v2139_v35 }
0x1474   :  { %2181 = vrot.lane.b32.xlu0 %v4221_v36, %s3761_s18 }
0x14e6   :  { %v2182_v41 = vpop.permute.xlu0 %2181 }
0x14e7   :  { %3465 = vmatmul.mubr.msk.f32.vlgmr.msra.gmra.mrb[20].mxu0 %vm218_vm4, %v2182_v41  ;;  %3481 = vmatmul.mubr.msk.f32.vlgmr.msra.gmra.mrb[24].mxu1 %vm218_vm4, %v2182_v41 }
0x14e8   :  { %3647 = vmatpush3.bf16.msra.mxu0 %v3918_v45  ;;  %3491 = vmatprep.mubr.msk.f32.mxu0 %vm3760_vm1, %v3759_v1 }
0x14e9   :  { %3648 = vmatprep.subr.bf16.mxu0 %v3763_v23  ;;  %3653 = vmatpush3.bf16.msra.mxu1 %v3865_v24 }
0x14ea   :  { %3654 = vmatprep.subr.bf16.mxu1 %v3763_v23  ;;  %3502 = vmatprep.mubr.msk.f32.mxu1 %vm3760_vm1, %v3759_v1 }
0x14ec   :  { %3650 = vmatpush3.bf16.msra.mxu0 %v3929_v49 }
0x14ed   :  { %3505 = vmatprep.subr.mxu0 %v3759_v1  ;;  %3656 = vmatpush3.bf16.msra.mxu1 %v3886_v32 }
0x14ee   :  { %3663 = vmatprep.subr.bf16.mxu1 %v3763_v23 }
0x14ef   :  { %3492 = vmatmul.mubr.msk.f32.vlgmr.msra.gmra.mrb[22].mxu0 %vm218_vm4, %v2182_v41 }
0x14f0   :  { %3506 = vmatpush3.msk.msra.mxu0 %vm76_vm0, %v3822_v0  ;;  %3507 = vmatprep.mubr.msk.f32.mxu0 %vm3760_vm1, %v3759_v1 }
0x14f1   :  { %3657 = vmatprep.subr.bf16.mxu0 %v3763_v23 }
0x14f3   :  { %3508 = vmatmul.mubr.msk.f32.vlgmr.msra.gmra.mrb[24].mxu0 %vm73_vm3, %v2679_v15 }
0x14f4   :  { %3659 = vmatpush3.bf16.msra.mxu0 %v3877_v29  ;;  %3518 = vmatprep.mubr.msk.f32.mxu0 %vm3760_vm1, %v3759_v1 }
0x14f5   :  { %3660 = vmatprep.subr.bf16.mxu0 %v3763_v23 }
0x14f8   :  { %3662 = vmatpush3.bf16.msra.mxu0 %v3898_v37 }
0x14f9   :  { %3669 = vmatprep.subr.bf16.mxu0 %v3763_v23 }
0x15ba   :  { %v2251_v42 = vpop.f32.mrb[20].mxu0  ;;  %v2426_v43 = vpop.f32.mrb[24].mxu1 }
0x15bb   :  { %v2252_v44 = vadd.f32 %v3955_v56, %v2251_v42  ;;  %v2507_v46 = vadd.f32 %v2426_v43, %v3950_v55  ;;  %v3466_v47 = vpop.f32.mrb[21].mxu0  ;;  %v3482_v48 = vpop.f32.mrb[25].mxu1  ;;  %v2500_v61 = vadd.f32 %v2426_v43, %v2357_v60 }
0x15bd   :  { %v2262_v51 = vrot.slane %v2252_v44, %v3958_v59  ;;  %2509 = vrot.lane.b32.xlu1 %v2507_v46, %s3761_s18  ;;  %v3127_v62 = vmul.f32 -1.442695, %v2500_v61  ;;  %v973_v61 = vrot.slane %v4050_v16, %v3958_v59 }
0x15bf   :  { %v2263_v52 = vcombine.high %v2262_v51, %v2262_v51  ;;  %v2270_v0 = vrot.slane %v2262_v51, %v3958_v59  ;;  %3721 = vpow2.f32 %v3127_v62  ;;  %v183_v51 = vrot.slane %v3908_v40, %v3958_v59 }
0x15c0   :  { %v981_v40 = vrot.slane %v973_v61, %v3958_v59 }
0x15c1   :  { %v2277_v53 = vrot.slane %v2263_v52, %v3958_v59  ;;  %2280 = vst.msk [vmem:[%s4434_s8 + $0x5] sm:$0x1] %vm316_vm5, %v2270_v0  ;;  %v191_v0 = vrot.slane %v183_v51, %v3958_v59 }
0x15c2   :  { %v2496_v57 = vpop.f32.mrb[22].mxu0 }
0x15c3   :  { %2281 = vst.msk [vmem:[%s4434_s8 + $0xd] sm:$0x1] %vm316_vm5, %v2277_v53  ;;  %v3493_v58 = vpop.f32.mrb[23].mxu0  ;;  %v581_v53 = vrot.slane %v3993_v33, %v3958_v59  ;;  %v1365_v33 = vrot.slane %v4107_v3, %v3958_v59 }
0x15c4   :  { %v4321_v58 = vsub.s32 0, %v3948_v54 }
0x15c5   :  { %v1373_v54 = vrot.slane %v1365_v33, %v3958_v59  ;;  %v582_v6 = vcombine.high %v581_v53, %v581_v53 }
0x15c6   :  { %v2748_v29 = vpop.f32.mrb[24].mxu0  ;;  %v202_v62 = vrot.slane %v191_v0, %v4321_v58  ;;  %v992_v16 = vrot.slane %v981_v40, %v4321_v58 }
0x15c7   :  { %v3509_v21 = vpop.f32.mrb[25].mxu0  ;;  %v1384_v3 = vrot.slane %v1373_v54, %v4321_v58 }
0x15c9   :  { %v3722_v63 = vpop.eup %3721 }
0x15ca   :  { %v2504_v2 = vadd.f32 1.0, %v3722_v63 }
0x15cc   :  { %3723 = vrcp.f32 %v2504_v2  ;;  %v1757_v2 = vrot.slane %v4164_v50, %v3958_v59 }
0x15d6   :  { %v3724_v4 = vpop.eup %3723 }
0x162f   :  { %v2510_v5 = vpop.permute.xlu1 %2509 }
0x1630   :  { %v2512_v7 = vmul.f32 %v3724_v4, %v2510_v5  ;;  %v2149_v5 = vrot.slane %v4221_v36, %v3958_v59 }
0x1632   :  { %2514 = vrot.lane.b32.xlu0 %v2512_v7, %s3761_s18  ;;  %v2157_v7 = vrot.slane %v2149_v5, %v3958_v59 }
0x16a4   :  { %v2515_v8 = vpop.permute.xlu0 %2514 }
0x16a5   :  { %v2517_v9 = vadd.f32 %v2515_v8, %v2357_v60  ;;  %v589_v60 = vrot.slane %v581_v53, %v3958_v59 }
0x16a7   :  { %3725 = vtanh.f32 %v2517_v9  ;;  %v600_v63 = vrot.slane %v589_v60, %v4321_v58 }
0x16b1   :  { %v3726_v10 = vpop.eup %3725 }
0x16b2   :  { %2520 = vrot.lane.b32.xlu1 %v3726_v10, %s3761_s18 }
0x1724   :  { %v2521_v11 = vpop.permute.xlu1 %2520 }
0x1725   :  { %v2523_v12 = vsub.f32 %v2496_v57, %v2521_v11  ;;  %v184_v11 = vcombine.high %v183_v51, %v183_v51 }
0x1727   :  { %2525 = vrot.lane.b32.xlu0 %v2523_v12, %s3764_s3  ;;  %v198_v14 = vrot.slane %v184_v11, %v3958_v59 }
0x1799   :  { %v2526_v17 = vpop.permute.xlu0 %2525 }
0x179a   :  { %v2528_v18 = vmul.f32 %v3724_v4, %v2526_v17  ;;  %v1765_v4 = vrot.slane %v1757_v2, %v3958_v59 }
0x179c   :  { %2530 = vrot.lane.b32.xlu1 %v2528_v18, %s3764_s3  ;;  %v1776_v50 = vrot.slane %v1765_v4, %v4321_v58  ;;  %v974_v18 = vcombine.high %v973_v61, %v973_v61 }
0x180e   :  { %v2531_v19 = vpop.permute.xlu1 %2530 }
0x180f   :  { %v4278_v20 = vadd.f32 %v3726_v10, %v2531_v19  ;;  %v2168_v10 = vrot.slane %v2157_v7, %v4321_v58 }
0x1811   :  { %2573 = vrot.lane.b32.xlu0 %v4278_v20, %s3761_s18  ;;  %v2541_v8 = vrot.slane %v4278_v20, %v3958_v59  ;;  %v206_v20 = vrot.slane %v198_v14, %v4321_v58 }
0x1813   :  { %v2549_v9 = vrot.slane %v2541_v8, %v3958_v59 }
0x1815   :  { %v2560_v36 = vrot.slane %v2549_v9, %v4321_v58 }
0x1883   :  { %v2574_v22 = vpop.permute.xlu0 %2573 }
0x1884   :  { %3503 = vmatmul.mubr.msk.f32.vlgmr.msra.gmra.mrb[26].mxu1 %vm218_vm4, %v2574_v22  ;;  %3519 = vmatmul.mubr.msk.f32.vlgmr.msra.gmra.mrb[26].mxu0 %vm218_vm4, %v2574_v22 }
0x1885   :  { %3665 = vmatpush3.bf16.msra.mxu1 %v3918_v45  ;;  %3529 = vmatprep.mubr.msk.f32.mxu1 %vm3760_vm1, %v3759_v1 }
0x1886   :  { %3666 = vmatprep.subr.bf16.mxu1 %v3763_v23  ;;  %3671 = vmatpush3.bf16.msra.mxu0 %v3865_v24 }
0x1887   :  { %3672 = vmatprep.subr.bf16.mxu0 %v3763_v23  ;;  %3540 = vmatprep.mubr.msk.f32.mxu0 %vm3760_vm1, %v3759_v1 }
0x1889   :  { %3668 = vmatpush3.bf16.msra.mxu1 %v3929_v49 }
0x188a   :  { %3674 = vmatpush3.bf16.msra.mxu0 %v3886_v32 }
0x188c   :  { %3530 = vmatmul.mubr.msk.f32.vlgmr.msra.gmra.mrb[28].mxu1 %vm218_vm4, %v2574_v22 }
0x1957   :  { %v2643_v37 = vpop.f32.mrb[26].mxu1  ;;  %v2818_v45 = vpop.f32.mrb[26].mxu0 }
0x1958   :  { %v2644_v25 = vadd.f32 %v3955_v56, %v2643_v37  ;;  %v2899_v26 = vadd.f32 %v2818_v45, %v3950_v55  ;;  %v3504_v27 = vpop.f32.mrb[27].mxu1  ;;  %v3520_v28 = vpop.f32.mrb[27].mxu0  ;;  %v3733_v56 = vld [vmem:[%s4428_s2] ss:$0 sm:$0xff]  ;;  %v1366_v37 = vcombine.high %v1365_v33, %v1365_v33  ;;  %s3766_s2 = smov [#allocation2]  }
0x1959   :  { %v2749_v30 = vadd.f32 %v3733_v56, %v2748_v29  ;;  %v596_v29 = vrot.slane %v582_v6, %v3958_v59  ;;  %v1758_v27 = vcombine.high %v1757_v2, %v1757_v2  ;;  %v2542_v56 = vcombine.high %v2541_v8, %v2541_v8 }
0x195a   :  { %v2654_v24 = vrot.slane %v2644_v25, %v3958_v59  ;;  %2901 = vrot.lane.b32.xlu1 %v2899_v26, %s3761_s18  ;;  %v988_v25 = vrot.slane %v974_v18, %v3958_v59 }
0x195b   :  { %v2892_v31 = vadd.f32 %v2818_v45, %v2749_v30  ;;  %v604_v45 = vrot.slane %v596_v29, %v4321_v58 }
0x195c   :  { %v2655_v23 = vcombine.high %v2654_v24, %v2654_v24  ;;  %v2662_v1 = vrot.slane %v2654_v24, %v3958_v59  ;;  %v996_v28 = vrot.slane %v988_v25, %v4321_v58  ;;  %v1380_v24 = vrot.slane %v1366_v37, %v3958_v59 }
0x195d   :  { %v3133_v34 = vmul.f32 -1.442695, %v2892_v31 }
0x195e   :  { %v2669_v49 = vrot.slane %v2655_v23, %v3958_v59  ;;  %2672 = vst.msk [vmem:[%s4434_s8 + $0x6] sm:$0x1] %vm316_vm5, %v2662_v1  ;;  %v2150_v1 = vcombine.high %v2149_v5, %v2149_v5 }
0x195f   :  { %v2888_v32 = vpop.f32.mrb[28].mxu1  ;;  %3727 = vpow2.f32 %v3133_v34 }
0x1960   :  { %2673 = vst.msk [vmem:[%s4434_s8 + $0xe] sm:$0x1] %vm316_vm5, %v2669_v49  ;;  %v3531_v55 = vpop.f32.mrb[29].mxu1  ;;  %v1388_v49 = vrot.slane %v1380_v24, %v4321_v58  ;;  %v2164_v31 = vrot.slane %v2150_v1, %v3958_v59 }
0x1969   :  { %v3728_v35 = vpop.eup %3727 }
0x196a   :  { %v2896_v38 = vadd.f32 1.0, %v3728_v35 }
0x196c   :  { %3729 = vrcp.f32 %v2896_v38  ;;  %v2172_v38 = vrot.slane %v2164_v31, %v4321_v58 }
0x1976   :  { %v3730_v39 = vpop.eup %3729 }
0x19cc   :  { %v2902_v41 = vpop.permute.xlu1 %2901 }
0x19cd   :  { %v2904_v42 = vmul.f32 %v3730_v39, %v2902_v41 }
0x19cf   :  { %2906 = vrot.lane.b32.xlu0 %v2904_v42, %s3761_s18 }
0x1a41   :  { %v2907_v43 = vpop.permute.xlu0 %2906 }
0x1a42   :  { %v2909_v44 = vadd.f32 %v2907_v43, %v2749_v30 }
0x1a44   :  { %3731 = vtanh.f32 %v2909_v44 }
0x1a4e   :  { %v3732_v46 = vpop.eup %3731 }
0x1a4f   :  { %2912 = vrot.lane.b32.xlu1 %v3732_v46, %s3761_s18 }
0x1ac1   :  { %v2913_v47 = vpop.permute.xlu1 %2912 }
0x1ac2   :  { %v2915_v48 = vsub.f32 %v2888_v32, %v2913_v47  ;;  %v1772_v32 = vrot.slane %v1758_v27, %v3958_v59 }
0x1ac4   :  { %2917 = vrot.lane.b32.xlu0 %v2915_v48, %s3764_s3  ;;  %v1780_v30 = vrot.slane %v1772_v32, %v4321_v58 }
0x1b36   :  { %v2918_v52 = vpop.permute.xlu0 %2917 }
0x1b37   :  { %v2920_v57 = vmul.f32 %v3730_v39, %v2918_v52  ;;  %v2556_v39 = vrot.slane %v2542_v56, %v3958_v59 }
0x1b39   :  { %2922 = vrot.lane.b32.xlu1 %v2920_v57, %s3764_s3  ;;  %v2564_v42 = vrot.slane %v2556_v39, %v4321_v58 }
0x1b3d   :  { %207 = vrot.lane.b32.xlu1 %v202_v62, %s3761_s18 }
0x1b41   :  { %605 = vrot.lane.b32.xlu1 %v600_v63, %s3761_s18 }
0x1b45   :  { %997 = vrot.lane.b32.xlu1 %v992_v16, %s3761_s18 }
0x1b49   :  { %1389 = vrot.lane.b32.xlu1 %v1384_v3, %s3761_s18 }
0x1b4d   :  { %1781 = vrot.lane.b32.xlu1 %v1776_v50, %s3761_s18 }
0x1b51   :  { %2173 = vrot.lane.b32.xlu1 %v2168_v10, %s3761_s18 }
0x1b55   :  { %2565 = vrot.lane.b32.xlu1 %v2560_v36, %s3761_s18 }
0x1bab   :  { %v2923_v12 = vpop.permute.xlu1 %2922 }
0x1bac   :  { %v2925_v13 = vadd.f32 %v3732_v46, %v2923_v12 }
0x1bae   :  { %v2933_v15 = vrot.slane %v2925_v13, %v3958_v59  ;;  %2965 = vrot.lane.b32.xlu0 %v2925_v13, %s3761_s18 }
0x1baf   :  { %v208_v17 = vpop.permute.xlu1 %207 }
0x1bb0   :  { %v2941_v19 = vrot.slane %v2933_v15, %v3958_v59  ;;  %214 = vst.msk [vmem:[#allocation2] sm:$0x1] %vm213_vm6, %v208_v17  ;;  %v2934_v35 = vcombine.high %v2933_v15, %v2933_v15 }
0x1bb2   :  { %209 = vrot.lane.b32.xlu0 %v206_v20, %s3761_s18  ;;  %v2952_v21 = vrot.slane %v2941_v19, %v4321_v58  ;;  %v2948_v43 = vrot.slane %v2934_v35, %v3958_v59 }
0x1bb3   :  { %v606_v22 = vpop.permute.xlu1 %605 }
0x1bb4   :  { %611 = vst.msk [vmem:[#allocation2 + $0x1] sm:$0x1] %vm213_vm6, %v606_v22  ;;  %2957 = vrot.lane.b32.xlu1 %v2952_v21, %s3761_s18  ;;  %v2956_v44 = vrot.slane %v2948_v43, %v4321_v58 }
0x1bb6   :  { %607 = vrot.lane.b32.xlu0 %v604_v45, %s3761_s18 }
0x1bb7   :  { %v998_v26 = vpop.permute.xlu1 %997 }
0x1bb8   :  { %1003 = vst.msk [vmem:[#allocation2 + $0x2] sm:$0x1] %vm213_vm6, %v998_v26 }
0x1bba   :  { %999 = vrot.lane.b32.xlu0 %v996_v28, %s3761_s18 }
0x1bbb   :  { %v1390_v23 = vpop.permute.xlu1 %1389 }
0x1bbc   :  { %1395 = vst.msk [vmem:[#allocation2 + $0x3] sm:$0x1] %vm213_vm6, %v1390_v23 }
0x1bbe   :  { %1391 = vrot.lane.b32.xlu0 %v1388_v49, %s3761_s18 }
0x1bbf   :  { %v1782_v55 = vpop.permute.xlu1 %1781 }
0x1bc0   :  { %1787 = vst.msk [vmem:[#allocation2 + $0x4] sm:$0x1] %vm213_vm6, %v1782_v55 }
0x1bc2   :  { %1783 = vrot.lane.b32.xlu0 %v1780_v30, %s3761_s18 }
0x1bc3   :  { %v2174_v34 = vpop.permute.xlu1 %2173 }
0x1bc4   :  { %2179 = vst.msk [vmem:[#allocation2 + $0x5] sm:$0x1] %vm213_vm6, %v2174_v34 }
0x1bc6   :  { %2175 = vrot.lane.b32.xlu0 %v2172_v38, %s3761_s18 }
0x1bc7   :  { %v2566_v41 = vpop.permute.xlu1 %2565 }
0x1bc8   :  { %2571 = vst.msk [vmem:[#allocation2 + $0x6] sm:$0x1] %vm213_vm6, %v2566_v41 }
0x1bca   :  { %2567 = vrot.lane.b32.xlu0 %v2564_v42, %s3761_s18 }
0x1bce   :  { %2959 = vrot.lane.b32.xlu0 %v2956_v44, %s3761_s18  ;;  %s3073_s18 = sshll.u32 %s3766_s2, 4  ;;  %s3074_s18 = int_to_ptr.vmem [resolvable:$true] %s3073_s18 }
0x1bcf   :  { %s3735_s3 = scalar_lea.vmem %s3074_s18, 256  ;;  %p3740_p1 = scmp.lt.s32.totalorder %s3074_s18, %s3074_s18 }
0x1bd0   :  { %p3736_p0 = scmp.ne.s32.totalorder %s3074_s18, %s3735_s3  ;;  %p3741_p2 = scmp.lt.s32.totalorder %s3735_s3, %s3735_s3 }
0x1bd2   :  { %p3742_p3 = por %p3741_p2, %p3740_p1 }
0x1bd4   :  { %p3743_p4 = pnand %p3742_p3, %p3736_p0 }
0x1c20   :  { %v2966_v46 = vpop.permute.xlu0 %2965 }
0x1c21   :  { %3541 = vmatmul.mubr.msk.f32.vlgmr.msra.gmra.mrb[28].mxu0 %vm218_vm4, %v2966_v46 }
0x1c24   :  { %v210_v47 = vpop.permute.xlu0 %209 }
0x1c25   :  { %215 = vst.msk [vmem:[#allocation2 + $0x8] sm:$0x1] %vm213_vm6, %v210_v47 }
0x1c26   :  { %v2958_v48 = vpop.permute.xlu1 %2957 }
0x1c27   :  { %2963 = vst.msk [vmem:[#allocation2 + $0x7] sm:$0x1] %vm213_vm6, %v2958_v48 }
0x1c28   :  { %v608_v51 = vpop.permute.xlu0 %607 }
0x1c29   :  { %612 = vst.msk [vmem:[#allocation2 + $0x9] sm:$0x1] %vm213_vm6, %v608_v51 }
0x1c2c   :  { %v1000_v52 = vpop.permute.xlu0 %999 }
0x1c2d   :  { %1004 = vst.msk [vmem:[#allocation2 + $0xa] sm:$0x1] %vm213_vm6, %v1000_v52 }
0x1c30   :  { %v1392_v0 = vpop.permute.xlu0 %1391 }
0x1c31   :  { %1396 = vst.msk [vmem:[#allocation2 + $0xb] sm:$0x1] %vm213_vm6, %v1392_v0 }
0x1c34   :  { %v1784_v53 = vpop.permute.xlu0 %1783 }
0x1c35   :  { %1788 = vst.msk [vmem:[#allocation2 + $0xc] sm:$0x1] %vm213_vm6, %v1784_v53 }
0x1c38   :  { %v2176_v57 = vpop.permute.xlu0 %2175 }
0x1c39   :  { %2180 = vst.msk [vmem:[#allocation2 + $0xd] sm:$0x1] %vm213_vm6, %v2176_v57 }
0x1c3c   :  { %v2568_v58 = vpop.permute.xlu0 %2567 }
0x1c3d   :  { %2572 = vst.msk [vmem:[#allocation2 + $0xe] sm:$0x1] %vm213_vm6, %v2568_v58 }
0x1c40   :  { %v2960_v60 = vpop.permute.xlu0 %2959 }
0x1c41   :  { %2964 = vst.msk [vmem:[#allocation2 + $0xf] sm:$0x1] %vm213_vm6, %v2960_v60 }
0x1c42   :  { %3746 = shalt.err (!%p3743_p4)
}
0x1c43   :  { %s3747_s11 = scalar_lea.hbm %s4435_s9, 256 }
0x1c44   :  { %p3748_p5 = scmp.ne.s32.totalorder %s4435_s9, %s3747_s11  ;;  %p3751_p6 = scmp.lt.u32.totalorder %s3747_s11, %s4435_s9 }
0x1c46   :  { %p3753_p7 = pnand %p3751_p6, %p3748_p5 }
0x1c48   :  { %3756 = shalt.err (!%p3753_p7)
}
0x1c49   :  { %s3767_s15 = smov 128   ;;  %s3768_s16 = smov 8   ;;  %v3734_v62 = vld [vmem:[%s4433_s7] ss:$0 sm:$0xff] }
0x1c4a   :  { %3079 = dma.vmem_to_hbm [thread:$0]  %s3074_s18, 256, %s4435_s9, [#allocation3], %s3767_s15, %s3767_s15, %s3768_s16  }
0x1cf4   :  { %v3035_v61 = vpop.f32.mrb[28].mxu0 }
0x1cf5   :  { %v3036_v40 = vadd.f32 %v3734_v62, %v3035_v61  ;;  %v3542_v33 = vpop.f32.mrb[29].mxu0 }
0x1cf7   :  { %v3046_v63 = vrot.slane %v3036_v40, %v3958_v59 }
0x1cf9   :  { %v3047_v54 = vcombine.high %v3046_v63, %v3046_v63  ;;  %v3054_v2 = vrot.slane %v3046_v63, %v3958_v59 }
0x1cfb   :  { %v3061_v16 = vrot.slane %v3047_v54, %v3958_v59  ;;  %3064 = vst.msk [vmem:[%s4434_s8 + $0x7] sm:$0x1] %vm316_vm5, %v3054_v2 }
0x1cfd   :  { %3065 = vst.msk [vmem:[%s4434_s8 + $0xf] sm:$0x1] %vm316_vm5, %v3061_v16 }
0x1cfe   :  { %3757 = dma.done.wait [#allocation3], 256  }
0x1cff   :  { %3758 = vsyncadd [#allocation3], 4294967040 }
0x1d00   :  { %3085 = vsyncpa [#allocation3], 1 }

</bundles_post_ra>
